<compile_context>
chip_gen: v5e
topology: v5e:2x2
jax: 0.10.0
libtpu: 0.0.40
codegen_flags: <defaults>
</compile_context>

<pallas_src>
import jax
import jax.numpy as jnp
import numpy as np
from jax.experimental import pallas as pl
from jax.experimental.pallas import tpu as pltpu


# --------------------------------------------------------------------------
# Fused Pallas kernel
# --------------------------------------------------------------------------

def make_fused_kernel(T, N, F, H, C_pad, rels_by_dst, D):
    """rels_by_dst[t] = ordered tuple of (relation_id, src_type) with dst == t,
    matching the column order of the lane-concatenated adjacency acat_t."""

    def kernel(*refs):
        (idx_ref,                 # (D, T)   int32  row table (-1 = NaN cell)
         feats_ref,               # (T*N, F)
         in_w_ref, in_b_ref,      # (F, H), (1, H)
         w1s_ref, bsum1_ref,      # (H, R*H), (T, H)
         w2s_ref, bsum2_ref,      # (H, R*H), (T, H)
         ) = refs[0:8]
        acat_refs = refs[8:8 + T]                       # per dst type (N, k_t*N)
        (mw1_ref, mb1_ref,                              # (H, H), (1, H)
         mw2_ref, mb2_ref,                              # (H, H), (1, H)
         mw3_ref, mb3_ref) = refs[8 + T:14 + T]         # (H, C_pad), (1, C_pad)
        o_ref = refs[14 + T]                            # (D, C_pad) lane-dense out

        # ---- 1. shared input Linear + ReLU over every node of every type ----
        h0 = jnp.maximum(
            jnp.dot(feats_ref[...], in_w_ref[...],
                    preferred_element_type=jnp.float32) + in_b_ref[...],
            0.0)                                                     # (T*N, H)

        # ---- 2. RGCN: HeteroGraphConv(aggregate='sum') of GraphConv ----
        # out_t = sum_{r: dst(r)=t} A_r @ (X_{src(r)} @ W_r) + b_r
        def rgcn_layer(h_in, ws_ref, bsum_ref, apply_relu):
            # all X @ W_r at once: (T*N, H) @ (H, R*H) -> (T*N, R*H), 768 lanes
            xw_full = jnp.dot(h_in, ws_ref[...],
                              preferred_element_type=jnp.float32)
            outs = []
            for t in range(T):
                pieces = [xw_full[s * N:(s + 1) * N, r * H:(r + 1) * H]
                          for (r, s) in rels_by_dst[t]]
                xw_cat = (pieces[0] if len(pieces) == 1
                          else jnp.concatenate(pieces, axis=0))      # (k_t*N, H)
                out_t = jnp.dot(acat_refs[t][...], xw_cat,
                                preferred_element_type=jnp.float32)  # (N, H)
                out_t = out_t + bsum_ref[pl.ds(t, 1), :]             # summed biases
                if apply_relu:
                    out_t = jnp.maximum(out_t, 0.0)
                outs.append(out_t)
            return jnp.concatenate(outs, axis=0)                     # (T*N, H)

        h1 = rgcn_layer(h0, w1s_ref, bsum1_ref, True)
        h2 = rgcn_layer(h1, w2s_ref, bsum2_ref, False)               # stays in vregs

        # ---- 3. per-data-row gather-mean as a one-hot selection matmul ----
        idx_all = idx_ref[...]                                       # (D, T) int32
        col = jax.lax.broadcasted_iota(jnp.int32, (D, T * N), 1)     # global node id
        onehot = jnp.zeros((D, T * N), jnp.float32)
        for t in range(T):
            raw = idx_all[:, t:t + 1]                                # (D, 1)
            g = jnp.where(raw >= 0, raw + t * N, -1)                 # -1 never matches
            onehot = onehot + (col == g).astype(jnp.float32)
        feat_sum = jnp.dot(onehot, h2,
                           preferred_element_type=jnp.float32)       # (D, H)

        # reference bug: `num` is reset every feature iteration, so only the LAST
        # feature's presence survives (0 -> inf/nan, as in the original).
        num_col = (idx_all[:, T - 1:T] >= 0).astype(jnp.float32)     # (D, 1)
        feat_mean = feat_sum * pl.reciprocal(num_col, approx=True)   # EUP recip

        # ---- 4. MLP head (last layer pre-padded to C_pad lanes) ----
        m = jnp.maximum(
            jnp.dot(feat_mean, mw1_ref[...],
                    preferred_element_type=jnp.float32) + mb1_ref[...], 0.0)
        m = jnp.maximum(
            jnp.dot(m, mw2_ref[...],
                    preferred_element_type=jnp.float32) + mb2_ref[...], 0.0)
        o_ref[...] = jnp.dot(m, mw3_ref[...],
                             preferred_element_type=jnp.float32) + mb3_ref[...]

    return kernel


# --------------------------------------------------------------------------
# Wrapper (glue: parameter stacking / padding, single grid-less pallas_call)
# --------------------------------------------------------------------------

def aggregation_feature_forward(params, feats, adjs, rels, idx):
    T, N, F = feats.shape
    H = params["input_w"].shape[1]
    D = idx.shape[0]
    mw1, mb1, mw2, mb2, mw3, mb3 = params["mlp"]
    C = mw3.shape[1]
    C_pad = 128                     # lane-dense output store; sliced back below

    feats2d = feats.reshape(T * N, F)

    # lane-stacked relation weights: (H, R*H)
    w1s = jnp.concatenate(params["conv1_w"], axis=1)
    w2s = jnp.concatenate(params["conv2_w"], axis=1)

    # per-dst-type summed GraphConv biases: (T, H)
    def bias_sum(bs):
        rows = []
        for t in range(T):
            b = jnp.zeros((H,), jnp.float32)
            for r, (_s, d) in enumerate(rels):
                if d == t:
                    b = b + bs[r].reshape(H)
            rows.append(b)
        return jnp.stack(rows)
    bsum1 = bias_sum(params["conv1_b"])
    bsum2 = bias_sum(params["conv2_b"])

    # per-dst-type lane-concatenated adjacencies + the static slice schedule
    rels_by_dst, acats = [], []
    for t in range(T):
        rl = tuple((r, s) for r, (s, d) in enumerate(rels) if d == t)
        # dst types with no incoming relation would also fail in the reference
        assert rl, "dst node type with no incoming relation"
        rels_by_dst.append(rl)
        acats.append(jnp.concatenate([adjs[r] for (r, _s) in rl], axis=1))

    mw3p = jnp.zeros((H, C_pad), jnp.float32).at[:, :C].set(mw3)
    mb3p = jnp.zeros((1, C_pad), jnp.float32).at[:, :C].set(mb3)

    inputs = (idx, feats2d, params["input_w"], params["input_b"],
              w1s, bsum1, w2s, bsum2, *acats,
              mw1, mb1, mw2, mb2, mw3p, mb3p)

    # grid=() + whole-array VMEM specs: no pointless double-buffering for a
    # single-step pipeline; everything is resident once.
    vmem_spec = pl.BlockSpec(memory_space=pltpu.MemorySpace.VMEM)
    out_pad = pl.pallas_call(
        make_fused_kernel(T, N, F, H, C_pad, tuple(rels_by_dst), D),
        out_shape=jax.ShapeDtypeStruct((D, C_pad), jnp.float32),
        in_specs=[vmem_spec] * len(inputs),
        out_specs=vmem_spec,
    )(*inputs)
    return out_pad[:, :C]


# --------------------------------------------------------------------------
# Pure-JAX reference (for correctness check)
# --------------------------------------------------------------------------

def reference_forward(params, feats, adjs, rels, idx):
    T, N, F = feats.shape
    h0 = jnp.maximum(
        feats.reshape(T * N, F) @ params["input_w"] + params["input_b"], 0.0
    ).reshape(T, N, -1)

    def layer(h_in, Ws, bs, relu):
        outs = []
        for t in range(T):
            acc = None
            for r, (s, d) in enumerate(rels):
                if d == t:
                    contrib = adjs[r] @ (h_in[s] @ Ws[r]) + bs[r]
                    acc = contrib if acc is None else acc + contrib
            if relu:
                acc = jnp.maximum(acc, 0.0)
            outs.append(acc)
        return jnp.stack(outs)

    h1 = layer(h0, params["conv1_w"], params["conv1_b"], True)
    h2 = layer(h1, params["conv2_w"], params["conv2_b"], False)

    D = idx.shape[0]
    H = h2.shape[-1]
    rows = []
    idx_np = np.asarray(idx)
    for rr in range(D):
        acc = jnp.zeros((H,), jnp.float32)
        for t in range(T):
            i = int(idx_np[rr, t])
            if i >= 0:
                acc = acc + h2[t, i]
        num = 1.0 if int(idx_np[rr, T - 1]) >= 0 else 0.0   # reference bug
        rows.append(acc / num)
    fm = jnp.stack(rows)

    w1, b1, w2, b2, w3, b3 = params["mlp"]
    h = jnp.maximum(fm @ w1 + b1, 0.0)
    h = jnp.maximum(h @ w2 + b2, 0.0)
    return h @ w3 + b3


# --------------------------------------------------------------------------
# main
# --------------------------------------------------------------------------

if __name__ == "__main__":
    # types, nodes/type, in_dim, hidden (= hid_num in the original), classes, rows
    T, N, F, H, C, D = 4, 16, 8, 128, 10, 8
    rels = [(0, 1), (1, 0), (2, 3), (3, 2), (0, 0), (1, 1)]  # (src_type -> dst_type)

    key = jax.random.PRNGKey(0)
    keys = jax.random.split(key, 32)

    feats = jax.random.normal(keys[0], (T, N, F), jnp.float32)

    adjs = []
    for r in range(len(rels)):
        a = (jax.random.uniform(keys[1 + r], (N, N)) < 0.3).astype(jnp.float32)
        # GraphConv norm='both': D_dst^{-1/2} A D_src^{-1/2}, degrees clamped >= 1
        in_deg = jnp.clip(a.sum(axis=1), 1.0, None)
        out_deg = jnp.clip(a.sum(axis=0), 1.0, None)
        adjs.append(a / jnp.sqrt(in_deg[:, None] * out_deg[None, :]))

    def lin_init(k, fan_in, fan_out):
        kw, kb = jax.random.split(k)
        s = 1.0 / np.sqrt(fan_in)
        w = jax.random.uniform(kw, (fan_in, fan_out), jnp.float32, -s, s)
        b = jax.random.uniform(kb, (1, fan_out), jnp.float32, -s, s)
        return w, b

    iw, ib = lin_init(keys[10], F, H)
    conv1 = [lin_init(keys[11 + r], H, H) for r in range(len(rels))]
    conv2 = [lin_init(keys[17 + r], H, H) for r in range(len(rels))]
    m1 = lin_init(keys[23], H, H)
    m2 = lin_init(keys[24], H, H)
    m3 = lin_init(keys[25], H, C)

    params = dict(
        input_w=iw, input_b=ib,
        conv1_w=[w for w, _ in conv1], conv1_b=[b for _, b in conv1],
        conv2_w=[w for w, _ in conv2], conv2_b=[b for _, b in conv2],
        mlp=(m1[0], m1[1], m2[0], m2[1], m3[0], m3[1]),
    )

    # int32 index table: idx[row, t] = node index of feature/node-type t for this
    # data row, or -1 for a NaN cell.  The last feature is always present so the
    # reference code's divisor `num` is 1 (never 0).
    idx = jax.random.randint(keys[30], (D, T), -1, N, dtype=jnp.int32)
    idx = idx.at[:, -1].set(jnp.maximum(idx[:, -1], 0))

    out = aggregation_feature_forward(params, feats, adjs, rels, idx)
    out = jax.block_until_ready(out)
    assert out.shape == (D, C) and out.dtype == jnp.float32

    ref = reference_forward(params, feats, adjs, rels, idx)
    np.testing.assert_allclose(np.asarray(out), np.asarray(ref), rtol=1e-2, atol=1e-2)

    print("KERNEL_OK")
</pallas_src>

<mosaic_0001>
module attributes {stable_mosaic.version = 11 : i64} {
  func.func @kernel(%arg0: memref<8x4xi32, #tpu.memory_space<vmem>>, %arg1: memref<64x8xf32, #tpu.memory_space<vmem>>, %arg2: memref<8x128xf32, #tpu.memory_space<vmem>>, %arg3: memref<1x128xf32, #tpu.memory_space<vmem>>, %arg4: memref<128x768xf32, #tpu.memory_space<vmem>>, %arg5: memref<4x128xf32, #tpu.memory_space<vmem>>, %arg6: memref<128x768xf32, #tpu.memory_space<vmem>>, %arg7: memref<4x128xf32, #tpu.memory_space<vmem>>, %arg8: memref<16x32xf32, #tpu.memory_space<vmem>>, %arg9: memref<16x32xf32, #tpu.memory_space<vmem>>, %arg10: memref<16x16xf32, #tpu.memory_space<vmem>>, %arg11: memref<16x16xf32, #tpu.memory_space<vmem>>, %arg12: memref<128x128xf32, #tpu.memory_space<vmem>>, %arg13: memref<1x128xf32, #tpu.memory_space<vmem>>, %arg14: memref<128x128xf32, #tpu.memory_space<vmem>>, %arg15: memref<1x128xf32, #tpu.memory_space<vmem>>, %arg16: memref<128x128xf32, #tpu.memory_space<vmem>>, %arg17: memref<1x128xf32, #tpu.memory_space<vmem>>, %arg18: memref<8x128xf32, #tpu.memory_space<vmem>>) attributes {dimension_semantics = [], scalar_prefetch = 0 : i64, scratch_operands = 0 : i64, tpu.core_type = #tpu.core_type<tc>} {
    %c0 = arith.constant 0 : index
    %c0_0 = arith.constant 0 : index
    %0 = vector.load %arg1[%c0, %c0_0] : memref<64x8xf32, #tpu.memory_space<vmem>>, vector<64x8xf32>
    %c0_1 = arith.constant 0 : index
    %c0_2 = arith.constant 0 : index
    %1 = vector.load %arg2[%c0_1, %c0_2] : memref<8x128xf32, #tpu.memory_space<vmem>>, vector<8x128xf32>
    %cst = arith.constant dense<0.000000e+00> : vector<64x128xf32>
    %2 = tpu.matmul %0, %1, %cst {dimension_numbers = #tpu.dot_dimension_numbers<[1], [0], [0], [1], [0, 0, 1, 1], [], []>} : vector<64x8xf32>, vector<8x128xf32>, vector<64x128xf32> -> vector<64x128xf32>
    %c0_3 = arith.constant 0 : index
    %c0_4 = arith.constant 0 : index
    %3 = vector.load %arg3[%c0_3, %c0_4] : memref<1x128xf32, #tpu.memory_space<vmem>>, vector<1x128xf32>
    %4 = vector.broadcast %3 : vector<1x128xf32> to vector<64x128xf32>
    %5 = arith.addf %2, %4 : vector<64x128xf32>
    %cst_5 = arith.constant 0.000000e+00 : f32
    %6 = vector.broadcast %cst_5 : f32 to vector<64x128xf32>
    %7 = arith.maximumf %5, %6 : vector<64x128xf32>
    %c0_6 = arith.constant 0 : index
    %c0_7 = arith.constant 0 : index
    %8 = vector.load %arg4[%c0_6, %c0_7] : memref<128x768xf32, #tpu.memory_space<vmem>>, vector<128x768xf32>
    %cst_8 = arith.constant dense<0.000000e+00> : vector<64x768xf32>
    %9 = tpu.matmul %7, %8, %cst_8 {dimension_numbers = #tpu.dot_dimension_numbers<[1], [0], [0], [1], [0, 0, 1, 1], [], []>} : vector<64x128xf32>, vector<128x768xf32>, vector<64x768xf32> -> vector<64x768xf32>
    %10 = vector.extract_strided_slice %9 {offsets = [16, 128], sizes = [16, 128], strides = [1, 1]} : vector<64x768xf32> to vector<16x128xf32>
    %11 = vector.extract_strided_slice %9 {offsets = [0, 512], sizes = [16, 128], strides = [1, 1]} : vector<64x768xf32> to vector<16x128xf32>
    %12 = tpu.concatenate %10, %11 in 0 : vector<16x128xf32>, vector<16x128xf32> -> vector<32x128xf32>
    %c0_9 = arith.constant 0 : index
    %c0_10 = arith.constant 0 : index
    %13 = vector.load %arg8[%c0_9, %c0_10] : memref<16x32xf32, #tpu.memory_space<vmem>>, vector<16x32xf32>
    %cst_11 = arith.constant dense<0.000000e+00> : vector<16x128xf32>
    %14 = tpu.matmul %13, %12, %cst_11 {dimension_numbers = #tpu.dot_dimension_numbers<[1], [0], [0], [1], [0, 0, 1, 1], [], []>} : vector<16x32xf32>, vector<32x128xf32>, vector<16x128xf32> -> vector<16x128xf32>
    %c0_12 = arith.constant 0 : index
    %c0_13 = arith.constant 0 : index
    %15 = vector.load %arg5[%c0_12, %c0_13] : memref<4x128xf32, #tpu.memory_space<vmem>>, vector<1x128xf32>
    %16 = vector.broadcast %15 : vector<1x128xf32> to vector<16x128xf32>
    %17 = arith.addf %14, %16 : vector<16x128xf32>
    %cst_14 = arith.constant 0.000000e+00 : f32
    %18 = vector.broadcast %cst_14 : f32 to vector<16x128xf32>
    %19 = arith.maximumf %17, %18 : vector<16x128xf32>
    %20 = vector.extract_strided_slice %9 {offsets = [0, 0], sizes = [16, 128], strides = [1, 1]} : vector<64x768xf32> to vector<16x128xf32>
    %21 = vector.extract_strided_slice %9 {offsets = [16, 640], sizes = [16, 128], strides = [1, 1]} : vector<64x768xf32> to vector<16x128xf32>
    %22 = tpu.concatenate %20, %21 in 0 : vector<16x128xf32>, vector<16x128xf32> -> vector<32x128xf32>
    %c0_15 = arith.constant 0 : index
    %c0_16 = arith.constant 0 : index
    %23 = vector.load %arg9[%c0_15, %c0_16] : memref<16x32xf32, #tpu.memory_space<vmem>>, vector<16x32xf32>
    %cst_17 = arith.constant dense<0.000000e+00> : vector<16x128xf32>
    %24 = tpu.matmul %23, %22, %cst_17 {dimension_numbers = #tpu.dot_dimension_numbers<[1], [0], [0], [1], [0, 0, 1, 1], [], []>} : vector<16x32xf32>, vector<32x128xf32>, vector<16x128xf32> -> vector<16x128xf32>
    %c1 = arith.constant 1 : index
    %c0_18 = arith.constant 0 : index
    %25 = vector.load %arg5[%c1, %c0_18] : memref<4x128xf32, #tpu.memory_space<vmem>>, vector<1x128xf32>
    %26 = vector.broadcast %25 : vector<1x128xf32> to vector<16x128xf32>
    %27 = arith.addf %24, %26 : vector<16x128xf32>
    %cst_19 = arith.constant 0.000000e+00 : f32
    %28 = vector.broadcast %cst_19 : f32 to vector<16x128xf32>
    %29 = arith.maximumf %27, %28 : vector<16x128xf32>
    %30 = vector.extract_strided_slice %9 {offsets = [48, 384], sizes = [16, 128], strides = [1, 1]} : vector<64x768xf32> to vector<16x128xf32>
    %c0_20 = arith.constant 0 : index
    %c0_21 = arith.constant 0 : index
    %31 = vector.load %arg10[%c0_20, %c0_21] : memref<16x16xf32, #tpu.memory_space<vmem>>, vector<16x16xf32>
    %cst_22 = arith.constant dense<0.000000e+00> : vector<16x128xf32>
    %32 = tpu.matmul %31, %30, %cst_22 {dimension_numbers = #tpu.dot_dimension_numbers<[1], [0], [0], [1], [0, 0, 1, 1], [], []>} : vector<16x16xf32>, vector<16x128xf32>, vector<16x128xf32> -> vector<16x128xf32>
    %c2 = arith.constant 2 : index
    %c0_23 = arith.constant 0 : index
    %33 = vector.load %arg5[%c2, %c0_23] : memref<4x128xf32, #tpu.memory_space<vmem>>, vector<1x128xf32>
    %34 = vector.broadcast %33 : vector<1x128xf32> to vector<16x128xf32>
    %35 = arith.addf %32, %34 : vector<16x128xf32>
    %cst_24 = arith.constant 0.000000e+00 : f32
    %36 = vector.broadcast %cst_24 : f32 to vector<16x128xf32>
    %37 = arith.maximumf %35, %36 : vector<16x128xf32>
    %38 = vector.extract_strided_slice %9 {offsets = [32, 256], sizes = [16, 128], strides = [1, 1]} : vector<64x768xf32> to vector<16x128xf32>
    %c0_25 = arith.constant 0 : index
    %c0_26 = arith.constant 0 : index
    %39 = vector.load %arg11[%c0_25, %c0_26] : memref<16x16xf32, #tpu.memory_space<vmem>>, vector<16x16xf32>
    %cst_27 = arith.constant dense<0.000000e+00> : vector<16x128xf32>
    %40 = tpu.matmul %39, %38, %cst_27 {dimension_numbers = #tpu.dot_dimension_numbers<[1], [0], [0], [1], [0, 0, 1, 1], [], []>} : vector<16x16xf32>, vector<16x128xf32>, vector<16x128xf32> -> vector<16x128xf32>
    %c3 = arith.constant 3 : index
    %c0_28 = arith.constant 0 : index
    %41 = vector.load %arg5[%c3, %c0_28] : memref<4x128xf32, #tpu.memory_space<vmem>>, vector<1x128xf32>
    %42 = vector.broadcast %41 : vector<1x128xf32> to vector<16x128xf32>
    %43 = arith.addf %40, %42 : vector<16x128xf32>
    %cst_29 = arith.constant 0.000000e+00 : f32
    %44 = vector.broadcast %cst_29 : f32 to vector<16x128xf32>
    %45 = arith.maximumf %43, %44 : vector<16x128xf32>
    %46 = tpu.concatenate %19, %29, %37, %45 in 0 : vector<16x128xf32>, vector<16x128xf32>, vector<16x128xf32>, vector<16x128xf32> -> vector<64x128xf32>
    %c0_30 = arith.constant 0 : index
    %c0_31 = arith.constant 0 : index
    %47 = vector.load %arg6[%c0_30, %c0_31] : memref<128x768xf32, #tpu.memory_space<vmem>>, vector<128x768xf32>
    %cst_32 = arith.constant dense<0.000000e+00> : vector<64x768xf32>
    %48 = tpu.matmul %46, %47, %cst_32 {dimension_numbers = #tpu.dot_dimension_numbers<[1], [0], [0], [1], [0, 0, 1, 1], [], []>} : vector<64x128xf32>, vector<128x768xf32>, vector<64x768xf32> -> vector<64x768xf32>
    %49 = vector.extract_strided_slice %48 {offsets = [16, 128], sizes = [16, 128], strides = [1, 1]} : vector<64x768xf32> to vector<16x128xf32>
    %50 = vector.extract_strided_slice %48 {offsets = [0, 512], sizes = [16, 128], strides = [1, 1]} : vector<64x768xf32> to vector<16x128xf32>
    %51 = tpu.concatenate %49, %50 in 0 : vector<16x128xf32>, vector<16x128xf32> -> vector<32x128xf32>
    %c0_33 = arith.constant 0 : index
    %c0_34 = arith.constant 0 : index
    %52 = vector.load %arg8[%c0_33, %c0_34] : memref<16x32xf32, #tpu.memory_space<vmem>>, vector<16x32xf32>
    %cst_35 = arith.constant dense<0.000000e+00> : vector<16x128xf32>
    %53 = tpu.matmul %52, %51, %cst_35 {dimension_numbers = #tpu.dot_dimension_numbers<[1], [0], [0], [1], [0, 0, 1, 1], [], []>} : vector<16x32xf32>, vector<32x128xf32>, vector<16x128xf32> -> vector<16x128xf32>
    %c0_36 = arith.constant 0 : index
    %c0_37 = arith.constant 0 : index
    %54 = vector.load %arg7[%c0_36, %c0_37] : memref<4x128xf32, #tpu.memory_space<vmem>>, vector<1x128xf32>
    %55 = vector.broadcast %54 : vector<1x128xf32> to vector<16x128xf32>
    %56 = arith.addf %53, %55 : vector<16x128xf32>
    %57 = vector.extract_strided_slice %48 {offsets = [0, 0], sizes = [16, 128], strides = [1, 1]} : vector<64x768xf32> to vector<16x128xf32>
    %58 = vector.extract_strided_slice %48 {offsets = [16, 640], sizes = [16, 128], strides = [1, 1]} : vector<64x768xf32> to vector<16x128xf32>
    %59 = tpu.concatenate %57, %58 in 0 : vector<16x128xf32>, vector<16x128xf32> -> vector<32x128xf32>
    %c0_38 = arith.constant 0 : index
    %c0_39 = arith.constant 0 : index
    %60 = vector.load %arg9[%c0_38, %c0_39] : memref<16x32xf32, #tpu.memory_space<vmem>>, vector<16x32xf32>
    %cst_40 = arith.constant dense<0.000000e+00> : vector<16x128xf32>
    %61 = tpu.matmul %60, %59, %cst_40 {dimension_numbers = #tpu.dot_dimension_numbers<[1], [0], [0], [1], [0, 0, 1, 1], [], []>} : vector<16x32xf32>, vector<32x128xf32>, vector<16x128xf32> -> vector<16x128xf32>
    %c1_41 = arith.constant 1 : index
    %c0_42 = arith.constant 0 : index
    %62 = vector.load %arg7[%c1_41, %c0_42] : memref<4x128xf32, #tpu.memory_space<vmem>>, vector<1x128xf32>
    %63 = vector.broadcast %62 : vector<1x128xf32> to vector<16x128xf32>
    %64 = arith.addf %61, %63 : vector<16x128xf32>
    %65 = vector.extract_strided_slice %48 {offsets = [48, 384], sizes = [16, 128], strides = [1, 1]} : vector<64x768xf32> to vector<16x128xf32>
    %c0_43 = arith.constant 0 : index
    %c0_44 = arith.constant 0 : index
    %66 = vector.load %arg10[%c0_43, %c0_44] : memref<16x16xf32, #tpu.memory_space<vmem>>, vector<16x16xf32>
    %cst_45 = arith.constant dense<0.000000e+00> : vector<16x128xf32>
    %67 = tpu.matmul %66, %65, %cst_45 {dimension_numbers = #tpu.dot_dimension_numbers<[1], [0], [0], [1], [0, 0, 1, 1], [], []>} : vector<16x16xf32>, vector<16x128xf32>, vector<16x128xf32> -> vector<16x128xf32>
    %c2_46 = arith.constant 2 : index
    %c0_47 = arith.constant 0 : index
    %68 = vector.load %arg7[%c2_46, %c0_47] : memref<4x128xf32, #tpu.memory_space<vmem>>, vector<1x128xf32>
    %69 = vector.broadcast %68 : vector<1x128xf32> to vector<16x128xf32>
    %70 = arith.addf %67, %69 : vector<16x128xf32>
    %71 = vector.extract_strided_slice %48 {offsets = [32, 256], sizes = [16, 128], strides = [1, 1]} : vector<64x768xf32> to vector<16x128xf32>
    %c0_48 = arith.constant 0 : index
    %c0_49 = arith.constant 0 : index
    %72 = vector.load %arg11[%c0_48, %c0_49] : memref<16x16xf32, #tpu.memory_space<vmem>>, vector<16x16xf32>
    %cst_50 = arith.constant dense<0.000000e+00> : vector<16x128xf32>
    %73 = tpu.matmul %72, %71, %cst_50 {dimension_numbers = #tpu.dot_dimension_numbers<[1], [0], [0], [1], [0, 0, 1, 1], [], []>} : vector<16x16xf32>, vector<16x128xf32>, vector<16x128xf32> -> vector<16x128xf32>
    %c3_51 = arith.constant 3 : index
    %c0_52 = arith.constant 0 : index
    %74 = vector.load %arg7[%c3_51, %c0_52] : memref<4x128xf32, #tpu.memory_space<vmem>>, vector<1x128xf32>
    %75 = vector.broadcast %74 : vector<1x128xf32> to vector<16x128xf32>
    %76 = arith.addf %73, %75 : vector<16x128xf32>
    %77 = tpu.concatenate %56, %64, %70, %76 in 0 : vector<16x128xf32>, vector<16x128xf32>, vector<16x128xf32>, vector<16x128xf32> -> vector<64x128xf32>
    %c0_53 = arith.constant 0 : index
    %c0_54 = arith.constant 0 : index
    %78 = vector.load %arg0[%c0_53, %c0_54] : memref<8x4xi32, #tpu.memory_space<vmem>>, vector<8x4xi32>
    %79 = tpu.iota {dimensions = array<i32: 1>} : vector<8x64xi32>
    %cst_55 = arith.constant 0.000000e+00 : f32
    %80 = vector.broadcast %cst_55 : f32 to vector<8x64xf32>
    %81 = vector.extract_strided_slice %78 {offsets = [0, 0], sizes = [8, 1], strides = [1, 1]} : vector<8x4xi32> to vector<8x1xi32>
    %c0_i32 = arith.constant 0 : i32
    %82 = vector.broadcast %c0_i32 : i32 to vector<8x1xi32>
    %83 = arith.cmpi sge, %81, %82 : vector<8x1xi32>
    %c0_i32_56 = arith.constant 0 : i32
    %84 = vector.broadcast %c0_i32_56 : i32 to vector<8x1xi32>
    %85 = arith.addi %81, %84 : vector<8x1xi32>
    %c-1_i32 = arith.constant -1 : i32
    %86 = vector.broadcast %c-1_i32 : i32 to vector<8x1xi32>
    %87 = arith.select %83, %85, %86 : vector<8x1xi1>, vector<8x1xi32>
    %88 = vector.broadcast %87 : vector<8x1xi32> to vector<8x64xi32>
    %89 = arith.cmpi eq, %79, %88 : vector<8x64xi32>
    %90 = arith.extui %89 : vector<8x64xi1> to vector<8x64xi32>
    %91 = arith.sitofp %90 : vector<8x64xi32> to vector<8x64xf32>
    %92 = arith.addf %80, %91 : vector<8x64xf32>
    %93 = vector.extract_strided_slice %78 {offsets = [0, 1], sizes = [8, 1], strides = [1, 1]} : vector<8x4xi32> to vector<8x1xi32>
    %c0_i32_57 = arith.constant 0 : i32
    %94 = vector.broadcast %c0_i32_57 : i32 to vector<8x1xi32>
    %95 = arith.cmpi sge, %93, %94 : vector<8x1xi32>
    %c16_i32 = arith.constant 16 : i32
    %96 = vector.broadcast %c16_i32 : i32 to vector<8x1xi32>
    %97 = arith.addi %93, %96 : vector<8x1xi32>
    %c-1_i32_58 = arith.constant -1 : i32
    %98 = vector.broadcast %c-1_i32_58 : i32 to vector<8x1xi32>
    %99 = arith.select %95, %97, %98 : vector<8x1xi1>, vector<8x1xi32>
    %100 = vector.broadcast %99 : vector<8x1xi32> to vector<8x64xi32>
    %101 = arith.cmpi eq, %79, %100 : vector<8x64xi32>
    %102 = arith.extui %101 : vector<8x64xi1> to vector<8x64xi32>
    %103 = arith.sitofp %102 : vector<8x64xi32> to vector<8x64xf32>
    %104 = arith.addf %92, %103 : vector<8x64xf32>
    %105 = vector.extract_strided_slice %78 {offsets = [0, 2], sizes = [8, 1], strides = [1, 1]} : vector<8x4xi32> to vector<8x1xi32>
    %c0_i32_59 = arith.constant 0 : i32
    %106 = vector.broadcast %c0_i32_59 : i32 to vector<8x1xi32>
    %107 = arith.cmpi sge, %105, %106 : vector<8x1xi32>
    %c32_i32 = arith.constant 32 : i32
    %108 = vector.broadcast %c32_i32 : i32 to vector<8x1xi32>
    %109 = arith.addi %105, %108 : vector<8x1xi32>
    %c-1_i32_60 = arith.constant -1 : i32
    %110 = vector.broadcast %c-1_i32_60 : i32 to vector<8x1xi32>
    %111 = arith.select %107, %109, %110 : vector<8x1xi1>, vector<8x1xi32>
    %112 = vector.broadcast %111 : vector<8x1xi32> to vector<8x64xi32>
    %113 = arith.cmpi eq, %79, %112 : vector<8x64xi32>
    %114 = arith.extui %113 : vector<8x64xi1> to vector<8x64xi32>
    %115 = arith.sitofp %114 : vector<8x64xi32> to vector<8x64xf32>
    %116 = arith.addf %104, %115 : vector<8x64xf32>
    %117 = vector.extract_strided_slice %78 {offsets = [0, 3], sizes = [8, 1], strides = [1, 1]} : vector<8x4xi32> to vector<8x1xi32>
    %c0_i32_61 = arith.constant 0 : i32
    %118 = vector.broadcast %c0_i32_61 : i32 to vector<8x1xi32>
    %119 = arith.cmpi sge, %117, %118 : vector<8x1xi32>
    %c48_i32 = arith.constant 48 : i32
    %120 = vector.broadcast %c48_i32 : i32 to vector<8x1xi32>
    %121 = arith.addi %117, %120 : vector<8x1xi32>
    %c-1_i32_62 = arith.constant -1 : i32
    %122 = vector.broadcast %c-1_i32_62 : i32 to vector<8x1xi32>
    %123 = arith.select %119, %121, %122 : vector<8x1xi1>, vector<8x1xi32>
    %124 = vector.broadcast %123 : vector<8x1xi32> to vector<8x64xi32>
    %125 = arith.cmpi eq, %79, %124 : vector<8x64xi32>
    %126 = arith.extui %125 : vector<8x64xi1> to vector<8x64xi32>
    %127 = arith.sitofp %126 : vector<8x64xi32> to vector<8x64xf32>
    %128 = arith.addf %116, %127 : vector<8x64xf32>
    %cst_63 = arith.constant dense<0.000000e+00> : vector<8x128xf32>
    %129 = tpu.matmul %128, %77, %cst_63 {dimension_numbers = #tpu.dot_dimension_numbers<[1], [0], [0], [1], [0, 0, 1, 1], [], []>} : vector<8x64xf32>, vector<64x128xf32>, vector<8x128xf32> -> vector<8x128xf32>
    %130 = vector.extract_strided_slice %78 {offsets = [0, 3], sizes = [8, 1], strides = [1, 1]} : vector<8x4xi32> to vector<8x1xi32>
    %c0_i32_64 = arith.constant 0 : i32
    %131 = vector.broadcast %c0_i32_64 : i32 to vector<8x1xi32>
    %132 = arith.cmpi sge, %130, %131 : vector<8x1xi32>
    %133 = arith.extui %132 : vector<8x1xi1> to vector<8x1xi32>
    %134 = arith.sitofp %133 : vector<8x1xi32> to vector<8x1xf32>
    %135 = tpu.reciprocal %134 {approx = true} : vector<8x1xf32> -> vector<8x1xf32>
    %136 = vector.broadcast %135 : vector<8x1xf32> to vector<8x128xf32>
    %137 = arith.mulf %129, %136 : vector<8x128xf32>
    %c0_65 = arith.constant 0 : index
    %c0_66 = arith.constant 0 : index
    %138 = vector.load %arg12[%c0_65, %c0_66] : memref<128x128xf32, #tpu.memory_space<vmem>>, vector<128x128xf32>
    %cst_67 = arith.constant dense<0.000000e+00> : vector<8x128xf32>
    %139 = tpu.matmul %137, %138, %cst_67 {dimension_numbers = #tpu.dot_dimension_numbers<[1], [0], [0], [1], [0, 0, 1, 1], [], []>} : vector<8x128xf32>, vector<128x128xf32>, vector<8x128xf32> -> vector<8x128xf32>
    %c0_68 = arith.constant 0 : index
    %c0_69 = arith.constant 0 : index
    %140 = vector.load %arg13[%c0_68, %c0_69] : memref<1x128xf32, #tpu.memory_space<vmem>>, vector<1x128xf32>
    %141 = vector.broadcast %140 : vector<1x128xf32> to vector<8x128xf32>
    %142 = arith.addf %139, %141 : vector<8x128xf32>
    %cst_70 = arith.constant 0.000000e+00 : f32
    %143 = vector.broadcast %cst_70 : f32 to vector<8x128xf32>
    %144 = arith.maximumf %142, %143 : vector<8x128xf32>
    %c0_71 = arith.constant 0 : index
    %c0_72 = arith.constant 0 : index
    %145 = vector.load %arg14[%c0_71, %c0_72] : memref<128x128xf32, #tpu.memory_space<vmem>>, vector<128x128xf32>
    %cst_73 = arith.constant dense<0.000000e+00> : vector<8x128xf32>
    %146 = tpu.matmul %144, %145, %cst_73 {dimension_numbers = #tpu.dot_dimension_numbers<[1], [0], [0], [1], [0, 0, 1, 1], [], []>} : vector<8x128xf32>, vector<128x128xf32>, vector<8x128xf32> -> vector<8x128xf32>
    %c0_74 = arith.constant 0 : index
    %c0_75 = arith.constant 0 : index
    %147 = vector.load %arg15[%c0_74, %c0_75] : memref<1x128xf32, #tpu.memory_space<vmem>>, vector<1x128xf32>
    %148 = vector.broadcast %147 : vector<1x128xf32> to vector<8x128xf32>
    %149 = arith.addf %146, %148 : vector<8x128xf32>
    %cst_76 = arith.constant 0.000000e+00 : f32
    %150 = vector.broadcast %cst_76 : f32 to vector<8x128xf32>
    %151 = arith.maximumf %149, %150 : vector<8x128xf32>
    %c0_77 = arith.constant 0 : index
    %c0_78 = arith.constant 0 : index
    %152 = vector.load %arg16[%c0_77, %c0_78] : memref<128x128xf32, #tpu.memory_space<vmem>>, vector<128x128xf32>
    %cst_79 = arith.constant dense<0.000000e+00> : vector<8x128xf32>
    %153 = tpu.matmul %151, %152, %cst_79 {dimension_numbers = #tpu.dot_dimension_numbers<[1], [0], [0], [1], [0, 0, 1, 1], [], []>} : vector<8x128xf32>, vector<128x128xf32>, vector<8x128xf32> -> vector<8x128xf32>
    %c0_80 = arith.constant 0 : index
    %c0_81 = arith.constant 0 : index
    %154 = vector.load %arg17[%c0_80, %c0_81] : memref<1x128xf32, #tpu.memory_space<vmem>>, vector<1x128xf32>
    %155 = vector.broadcast %154 : vector<1x128xf32> to vector<8x128xf32>
    %156 = arith.addf %153, %155 : vector<8x128xf32>
    %c0_82 = arith.constant 0 : index
    %c0_83 = arith.constant 0 : index
    %157 = vector.load %arg18[%c0_82, %c0_83] : memref<8x128xf32, #tpu.memory_space<vmem>>, vector<8x128xf32>
    tpu.vector_store %arg18[%c0_82, %c0_83], %156 {strides = array<i32>} : memref<8x128xf32, #tpu.memory_space<vmem>>, vector<8x128xf32>,
    return
  }
}

</mosaic_0001>

<bundles_post_ra>
// kernel: tpu_custom_call.1
= control target key start
LH: loop header
LB: loop body
LE: loop exit
PB: predicated region body
PF: predicated region fallthrough
CT: control target
= control target key end

     0   :  { %s1961_s0 = inlined_call_operand.vmem [shape: s32[8,4], index: 0, kind: input, shape index: {}]   ;;  %s1962_s1 = inlined_call_operand.vmem [shape: f32[64,8], index: 1, kind: input, shape index: {}]   ;;  %s1963_s2 = inlined_call_operand.vmem [shape: f32[8,128], index: 2, kind: input, shape index: {}]   ;;  %s1964_s3 = inlined_call_operand.hbm [shape: f32[1,128], index: 3, kind: input, shape index: {}]   ;;  %s1965_s4 = inlined_call_operand.hbm [shape: f32[128,768], index: 4, kind: input, shape index: {}]   ;;  %s1966_s5 = inlined_call_operand.vmem [shape: f32[4,128], index: 5, kind: input, shape index: {}]   ;;  %s1967_s6 = inlined_call_operand.hbm [shape: f32[128,768], index: 6, kind: input, shape index: {}]   ;;  %s1968_s7 = inlined_call_operand.vmem [shape: f32[4,128], index: 7, kind: input, shape index: {}]   ;;  %s1969_s8 = inlined_call_operand.vmem [shape: f32[16,32], index: 8, kind: input, shape index: {}]   ;;  %s1970_s9 = inlined_call_operand.vmem [shape: f32[16,32], index: 9, kind: input, shape index: {}]   ;;  %s1971_s10 = inlined_call_operand.vmem [shape: f32[16,16], index: 10, kind: input, shape index: {}]   ;;  %s1972_s11 = inlined_call_operand.vmem [shape: f32[16,16], index: 11, kind: input, shape index: {}]   ;;  %s1973_s12 = inlined_call_operand.hbm [shape: f32[128,128], index: 12, kind: input, shape index: {}]   ;;  %s1974_s13 = inlined_call_operand.vmem [shape: f32[1,128], index: 13, kind: input, shape index: {}]   ;;  %s1975_s14 = inlined_call_operand.hbm [shape: f32[128,128], index: 14, kind: input, shape index: {}]   ;;  %s1976_s15 = inlined_call_operand.vmem [shape: f32[1,128], index: 15, kind: input, shape index: {}]   ;;  %s1977_s16 = inlined_call_operand.hbm [shape: f32[128,128], index: 16, kind: input, shape index: {}]   ;;  %s1978_s17 = inlined_call_operand.vmem [shape: f32[1,128], index: 17, kind: input, shape index: {}]   ;;  %s1979_s18 = inlined_call_operand.hbm [shape: f32[8,128], index: 18, kind: output, shape index: {}]  }
   0x1   :  { %1981 = sst [smem:[#allocation19_spill]] %s1961_s0 }
   0x2   :  { %1982 = sst [smem:[#allocation20_spill]] %s1962_s1 }
   0x3   :  { %1983 = sst [smem:[#allocation21_spill]] %s1963_s2 }
   0x4   :  { %1984 = sst [smem:[#allocation22_spill]] %s1979_s18 }
   0x5   :  { %23 = vsyncpa [#allocation3], 0 }
   0x6   :  { %24 = vsyncpa [#allocation6], 0 }
   0x7   :  { %25 = vsyncpa [#allocation9], 0 }
   0x8   :  { %26 = vsyncpa [#allocation12], 0  ;;  %s49_s29 = sshll.u32 %s1965_s4, 4  ;;  %s50_s29 = int_to_ptr.hbm [resolvable:$true] %s49_s29 }
   0x9   :  { %27 = vsyncpa [#allocation4], 0  ;;  %s1584_s30 = smov [#allocation5]   ;;  %s87_s20 = sshll.u32 %s1973_s12, 4  ;;  %s88_s20 = int_to_ptr.hbm [resolvable:$true] %s87_s20 }
   0xa   :  { %s51_s0 = sshll.u32 %s1584_s30, 4  ;;  %s1585_s21 = smov 768   ;;  %s52_s0 = int_to_ptr.vmem [resolvable:$true] %s51_s0 }
   0xb   :  { %s1586_s22 = smov 48   ;;  %s1587_s2 = smov [#allocation8]  }
   0xc   :  { %57 = dma.hbm_to_vmem [thread:$0]  %s50_s29, 12288, %s52_s0, [#allocation6], %s1585_s21, %s1585_s21, %s1586_s22  }
   0xd   :  { %s89_s23 = sshll.u32 %s1587_s2, 4  ;;  %s1588_s24 = smov 128   ;;  %s90_s23 = int_to_ptr.vmem [resolvable:$true] %s89_s23 }
   0xe   :  { %s1589_s25 = smov 8   ;;  %s39_s27 = sshll.u32 %s1964_s3, 4  ;;  %s40_s27 = int_to_ptr.hbm [resolvable:$true] %s39_s27 }
   0xf   :  { %95 = dma.hbm_to_vmem [thread:$0]  %s88_s20, 2048, %s90_s23, [#allocation9], %s1588_s24, %s1588_s24, %s1589_s25  }
  0x10   :  { %s1590_s28 = smov [#allocation2]   ;;  %s64_s1 = sshll.u32 %s1967_s6, 4  ;;  %s65_s1 = int_to_ptr.hbm [resolvable:$true] %s64_s1 }
  0x11   :  { %s41_s30 = sshll.u32 %s1590_s28, 4  ;;  %s1591_s29 = smov [#allocation7]   ;;  %s42_s30 = int_to_ptr.vmem [resolvable:$true] %s41_s30 }
  0x12   :  { %44 = dma.hbm_to_vmem [thread:$0]  %s40_s27, 16, %s42_s30, [#allocation3]  }
  0x13   :  { %s66_s0 = sshll.u32 %s1591_s29, 4  ;;  %s102_s20 = sshll.u32 %s1975_s14, 4  ;;  %s67_s0 = int_to_ptr.vmem [resolvable:$true] %s66_s0  ;;  %s103_s20 = int_to_ptr.hbm [resolvable:$true] %s102_s20 }
  0x14   :  { %72 = dma.hbm_to_vmem [thread:$0]  %s65_s1, 12288, %s67_s0, [#allocation6], %s1585_s21, %s1585_s21, %s1586_s22  }
  0x15   :  { %s117_s4 = sshll.u32 %s1977_s16, 4  ;;  %s1592_s26 = smov [#allocation10]   ;;  %s118_s4 = int_to_ptr.hbm [resolvable:$true] %s117_s4 }
  0x16   :  { %s104_s28 = sshll.u32 %s1592_s26, 4  ;;  %s1593_s6 = smov [#allocation11]   ;;  %s105_s28 = int_to_ptr.vmem [resolvable:$true] %s104_s28 }
  0x17   :  { %110 = dma.hbm_to_vmem [thread:$0]  %s103_s20, 2048, %s105_s28, [#allocation9], %s1588_s24, %s1588_s24, %s1589_s25  }
  0x18   :  { %s119_s27 = sshll.u32 %s1593_s6, 4  ;;  %s120_s27 = int_to_ptr.vmem [resolvable:$true] %s119_s27 }
  0x19   :  { %125 = dma.hbm_to_vmem [thread:$0]  %s118_s4, 2048, %s120_s27, [#allocation12], %s1588_s24, %s1588_s24, %s1589_s25  }
  0x1a   :  { %1574 = dma.done.wait [#allocation3], 16  }
  0x1b   :  { %1575 = vsyncadd [#allocation3], 4294967280 }
  0x1c   :  { %1576 = dma.done.wait [#allocation6], 24576  }
  0x1d   :  { %1577 = vsyncadd [#allocation6], 4294942720 }
  0x1e   :  { %1578 = dma.done.wait [#allocation9], 4096  }
  0x1f   :  { %1579 = vsyncadd [#allocation9], 4294963200 }
  0x20   :  { %1580 = dma.done.wait [#allocation12], 2048  }
  0x21   :  { %1581 = vsyncadd [#allocation12], 4294965248  ;;  %vm165_vm0 = vcmask 64512   ;;  %s1985_s18 = sld [smem:[#allocation21_spill]]  ;;  %v329_v5 = vld [vmem:[#allocation5 + $0x2d0] sm:$0xff]  ;;  %v330_v6 = vld [vmem:[#allocation5 + $0x2d8] sm:$0xff] }
  0x22   :  { %s1986_s30 = sld [smem:[#allocation20_spill]]  ;;  %v331_v7 = vld [vmem:[#allocation5 + $0x2e0] sm:$0xff]  ;;  %335 = vmatpush.msra.mxu1 %v329_v5  ;;  %370 = vmatpush.msra.mxu2 %v330_v6  ;;  %v332_v8 = vld [vmem:[#allocation5 + $0x2e8] sm:$0xff]  ;;  %v325_v11 = vld [vmem:[#allocation5 + $0x2b0] sm:$0xff]  ;;  %vm549_vm1 = vcmask 261120   ;;  %vm620_vm2 = vcmask 130048  }
  0x23   :  { %v323_v9 = vld [vmem:[#allocation5 + $0x2a0] sm:$0xff]  ;;  %v324_v10 = vld [vmem:[#allocation5 + $0x2a8] sm:$0xff]  ;;  %405 = vmatpush.msra.mxu3 %v331_v7  ;;  %v326_v12 = vld [vmem:[#allocation5 + $0x2b8] sm:$0xff]  ;;  %s1987_s28 = sld [smem:[#allocation19_spill]]  ;;  %vm1132_vm8 = vcmask 523264  }
  0x24   :  { %v317_v13 = vld [vmem:[#allocation5 + $0x270] sm:$0xff]  ;;  %336 = vmatpush.msra.mxu1 %v323_v9  ;;  %371 = vmatpush.msra.mxu2 %v324_v10  ;;  %v318_v14 = vld [vmem:[#allocation5 + $0x278] sm:$0xff]  ;;  %v319_v15 = vld [vmem:[#allocation5 + $0x280] sm:$0xff] }
  0x25   :  { %v320_v16 = vld [vmem:[#allocation5 + $0x288] sm:$0xff]  ;;  %406 = vmatpush.msra.mxu3 %v325_v11  ;;  %v311_v17 = vld [vmem:[#allocation5 + $0x240] sm:$0xff]  ;;  %v313_v20 = vld [vmem:[#allocation5 + $0x250] sm:$0xff] }
  0x26   :  { %v312_v18 = vld [vmem:[#allocation5 + $0x248] sm:$0xff]  ;;  %337 = vmatpush.msra.mxu1 %v317_v13  ;;  %372 = vmatpush.msra.mxu2 %v318_v14  ;;  %v314_v21 = vld [vmem:[#allocation5 + $0x258] sm:$0xff]  ;;  %v305_v22 = vld [vmem:[#allocation5 + $0x210] sm:$0xff] }
  0x27   :  { %v160_v0 = vld [vmem:[%s1985_s18] sm:$0xff]  ;;  %407 = vmatpush.msra.mxu3 %v319_v15  ;;  %v308_v25 = vld [vmem:[#allocation5 + $0x228] sm:$0xff]  ;;  %v301_v28 = vld [vmem:[#allocation5 + $0x1f0] sm:$0xff] }
  0x28   :  { %v152_v1 = vld [vmem:[%s1986_s30] sm:$0xff]  ;;  %205 = vmatpush.msra.mxu0 %v160_v0  ;;  %v153_v2 = vld [vmem:[%s1986_s30 + $0x8] sm:$0xff]  ;;  %v154_v3 = vld [vmem:[%s1986_s30 + $0x10] sm:$0xff]  ;;  %338 = vmatpush.msra.mxu1 %v311_v17 }
  0x29   :  { %1308 = vmatmul.msk.f32.vlgmr.msra.gmra.mxu0 %vm165_vm0, %v152_v1  ;;  %v155_v4 = vld [vmem:[%s1986_s30 + $0x18] sm:$0xff]  ;;  %v156_v19 = vld [vmem:[%s1986_s30 + $0x20] sm:$0xff]  ;;  %373 = vmatpush.msra.mxu2 %v312_v18  ;;  %v300_v27 = vld [vmem:[#allocation5 + $0x1e8] sm:$0xff] }
  0x2a   :  { %440 = vmatpush.msrb.mxu0 %v332_v8  ;;  %v306_v23 = vld [vmem:[#allocation5 + $0x218] sm:$0xff]  ;;  %v307_v24 = vld [vmem:[#allocation5 + $0x220] sm:$0xff]  ;;  %408 = vmatpush.msra.mxu3 %v313_v20  ;;  %v293_v30 = vld [vmem:[#allocation5 + $0x1b0] sm:$0xff] }
  0x2b   :  { %v299_v26 = vld [vmem:[#allocation5 + $0x1e0] sm:$0xff]  ;;  %339 = vmatpush.msra.mxu1 %v305_v22  ;;  %374 = vmatpush.msra.mxu2 %v306_v23  ;;  %v302_v29 = vld [vmem:[#allocation5 + $0x1f8] sm:$0xff]  ;;  %v296_v33 = vld [vmem:[#allocation5 + $0x1c8] sm:$0xff] }
  0x2c   :  { %441 = vmatpush.msrb.mxu0 %v326_v12  ;;  %409 = vmatpush.msra.mxu3 %v307_v24  ;;  %v294_v31 = vld [vmem:[#allocation5 + $0x1b8] sm:$0xff]  ;;  %v295_v32 = vld [vmem:[#allocation5 + $0x1c0] sm:$0xff]  ;;  %v288_v36 = vld [vmem:[#allocation5 + $0x188] sm:$0xff] }
  0x2d   :  { %340 = vmatpush.msra.mxu1 %v299_v26  ;;  %375 = vmatpush.msra.mxu2 %v300_v27  ;;  %v287_v34 = vld [vmem:[#allocation5 + $0x180] sm:$0xff]  ;;  %v289_v37 = vld [vmem:[#allocation5 + $0x190] sm:$0xff]  ;;  %v290_v38 = vld [vmem:[#allocation5 + $0x198] sm:$0xff] }
  0x2e   :  { %442 = vmatpush.msrb.mxu0 %v320_v16  ;;  %410 = vmatpush.msra.mxu3 %v301_v28  ;;  %v157_v35 = vld [vmem:[%s1986_s30 + $0x28] sm:$0xff]  ;;  %v281_v39 = vld [vmem:[#allocation5 + $0x150] sm:$0xff]  ;;  %v282_v40 = vld [vmem:[#allocation5 + $0x158] sm:$0xff] }
  0x2f   :  { %341 = vmatpush.msra.mxu1 %v293_v30  ;;  %376 = vmatpush.msra.mxu2 %v294_v31  ;;  %v283_v41 = vld [vmem:[#allocation5 + $0x160] sm:$0xff]  ;;  %v284_v42 = vld [vmem:[#allocation5 + $0x168] sm:$0xff]  ;;  %v277_v45 = vld [vmem:[#allocation5 + $0x130] sm:$0xff] }
  0x30   :  { %443 = vmatpush.msrb.mxu0 %v314_v21  ;;  %411 = vmatpush.msra.mxu3 %v295_v32  ;;  %v275_v43 = vld [vmem:[#allocation5 + $0x120] sm:$0xff]  ;;  %v276_v44 = vld [vmem:[#allocation5 + $0x128] sm:$0xff]  ;;  %v278_v46 = vld [vmem:[#allocation5 + $0x138] sm:$0xff] }
  0x31   :  { %1309 = vmatmul.msk.f32.gmra.mxu0 %vm165_vm0, %v153_v2  ;;  %342 = vmatpush.msra.mxu1 %v287_v34  ;;  %v269_v47 = vld [vmem:[#allocation5 + $0xf0] sm:$0xff]  ;;  %v270_v48 = vld [vmem:[#allocation5 + $0xf8] sm:$0xff]  ;;  %v271_v49 = vld [vmem:[#allocation5 + $0x100] sm:$0xff] }
  0x32   :  { %444 = vmatpush.msrb.mxu0 %v308_v25  ;;  %377 = vmatpush.msra.mxu2 %v288_v36  ;;  %v272_v50 = vld [vmem:[#allocation5 + $0x108] sm:$0xff]  ;;  %v263_v52 = vld [vmem:[#allocation5 + $0xc0] sm:$0xff]  ;;  %v265_v54 = vld [vmem:[#allocation5 + $0xd0] sm:$0xff] }
  0x33   :  { %412 = vmatpush.msra.mxu3 %v289_v37  ;;  %343 = vmatpush.msra.mxu1 %v281_v39  ;;  %v158_v51 = vld [vmem:[%s1986_s30 + $0x30] sm:$0xff]  ;;  %v266_v55 = vld [vmem:[#allocation5 + $0xd8] sm:$0xff]  ;;  %v259_v58 = vld [vmem:[#allocation5 + $0xa0] sm:$0xff] }
  0x34   :  { %445 = vmatpush.msrb.mxu0 %v302_v29  ;;  %378 = vmatpush.msra.mxu2 %v282_v40  ;;  %v264_v53 = vld [vmem:[#allocation5 + $0xc8] sm:$0xff]  ;;  %v257_v56 = vld [vmem:[#allocation5 + $0x90] sm:$0xff]  ;;  %v258_v57 = vld [vmem:[#allocation5 + $0x98] sm:$0xff] }
  0x35   :  { %413 = vmatpush.msra.mxu3 %v283_v41  ;;  %344 = vmatpush.msra.mxu1 %v275_v43  ;;  %v260_v59 = vld [vmem:[#allocation5 + $0xa8] sm:$0xff]  ;;  %v159_v60 = vld [vmem:[%s1986_s30 + $0x38] sm:$0xff]  ;;  %v251_v61 = vld [vmem:[#allocation5 + $0x60] sm:$0xff] }
  0x36   :  { %446 = vmatpush.msrb.mxu0 %v296_v33  ;;  %379 = vmatpush.msra.mxu2 %v276_v44  ;;  %v252_v62 = vld [vmem:[#allocation5 + $0x68] sm:$0xff]  ;;  %v253_v63 = vld [vmem:[#allocation5 + $0x70] sm:$0xff]  ;;  %v254_v0 = vld [vmem:[#allocation5 + $0x78] sm:$0xff] }
  0x37   :  { %414 = vmatpush.msra.mxu3 %v277_v45  ;;  %345 = vmatpush.msra.mxu1 %v269_v47  ;;  %v245_v1 = vld [vmem:[#allocation5 + $0x30] sm:$0xff]  ;;  %v246_v2 = vld [vmem:[#allocation5 + $0x38] sm:$0xff]  ;;  %v239_v5 = vld [vmem:[#allocation5] sm:$0xff] }
  0x38   :  { %447 = vmatpush.msrb.mxu0 %v290_v38  ;;  %380 = vmatpush.msra.mxu2 %v270_v48  ;;  %v240_v6 = vld [vmem:[#allocation5 + $0x8] sm:$0xff]  ;;  %v241_v7 = vld [vmem:[#allocation5 + $0x10] sm:$0xff]  ;;  %v242_v8 = vld [vmem:[#allocation5 + $0x18] sm:$0xff] }
  0x39   :  { %1310 = vmatmul.msk.f32.gmra.mxu0 %vm165_vm0, %v154_v3  ;;  %415 = vmatpush.msra.mxu3 %v271_v49  ;;  %v247_v3 = vld [vmem:[#allocation5 + $0x40] sm:$0xff]  ;;  %v1748_v9 = vld [vmem:[#allocation2] ss:$0 sm:$0xff]  ;;  %v333_v13 = vld [vmem:[#allocation5 + $0x2f0] sm:$0xff] }
  0x3a   :  { %448 = vmatpush.msrb.mxu0 %v284_v42  ;;  %346 = vmatpush.msra.mxu1 %v263_v52  ;;  %v334_v14 = vld [vmem:[#allocation5 + $0x2f8] sm:$0xff]  ;;  %v327_v16 = vld [vmem:[#allocation5 + $0x2c0] sm:$0xff]  ;;  %v328_v17 = vld [vmem:[#allocation5 + $0x2c8] sm:$0xff] }
  0x3b   :  { %381 = vmatpush.msra.mxu2 %v264_v53  ;;  %416 = vmatpush.msra.mxu3 %v265_v54  ;;  %v322_v20 = vld [vmem:[#allocation5 + $0x298] sm:$0xff]  ;;  %v315_v22 = vld [vmem:[#allocation5 + $0x260] sm:$0xff]  ;;  %v316_v23 = vld [vmem:[#allocation5 + $0x268] sm:$0xff] }
  0x3c   :  { %449 = vmatpush.msrb.mxu0 %v278_v46  ;;  %347 = vmatpush.msra.mxu1 %v257_v56  ;;  %v309_v24 = vld [vmem:[#allocation5 + $0x230] sm:$0xff]  ;;  %v310_v25 = vld [vmem:[#allocation5 + $0x238] sm:$0xff]  ;;  %v303_v27 = vld [vmem:[#allocation5 + $0x200] sm:$0xff] }
  0x3d   :  { %382 = vmatpush.msra.mxu2 %v258_v57  ;;  %417 = vmatpush.msra.mxu3 %v259_v58  ;;  %v304_v29 = vld [vmem:[#allocation5 + $0x208] sm:$0xff]  ;;  %v297_v31 = vld [vmem:[#allocation5 + $0x1d0] sm:$0xff]  ;;  %v298_v32 = vld [vmem:[#allocation5 + $0x1d8] sm:$0xff] }
  0x3e   :  { %450 = vmatpush.msrb.mxu0 %v272_v50  ;;  %348 = vmatpush.msra.mxu1 %v251_v61  ;;  %v291_v33 = vld [vmem:[#allocation5 + $0x1a0] sm:$0xff]  ;;  %v292_v34 = vld [vmem:[#allocation5 + $0x1a8] sm:$0xff]  ;;  %v285_v36 = vld [vmem:[#allocation5 + $0x170] sm:$0xff] }
  0x3f   :  { %383 = vmatpush.msra.mxu2 %v252_v62  ;;  %418 = vmatpush.msra.mxu3 %v253_v63  ;;  %v286_v38 = vld [vmem:[#allocation5 + $0x178] sm:$0xff]  ;;  %v279_v40 = vld [vmem:[#allocation5 + $0x140] sm:$0xff]  ;;  %v280_v41 = vld [vmem:[#allocation5 + $0x148] sm:$0xff] }
  0x40   :  { %451 = vmatpush.msrb.mxu0 %v266_v55  ;;  %349 = vmatpush.msra.mxu1 %v245_v1  ;;  %v273_v42 = vld [vmem:[#allocation5 + $0x110] sm:$0xff]  ;;  %v274_v43 = vld [vmem:[#allocation5 + $0x118] sm:$0xff]  ;;  %v267_v45 = vld [vmem:[#allocation5 + $0xe0] sm:$0xff] }
  0x41   :  { %1311 = vmatmul.msk.f32.gmra.mxu0 %vm165_vm0, %v155_v4  ;;  %384 = vmatpush.msra.mxu2 %v246_v2  ;;  %v248_v4 = vld [vmem:[#allocation5 + $0x48] sm:$0xff]  ;;  %v261_v49 = vld [vmem:[#allocation5 + $0xb0] sm:$0xff]  ;;  %v262_v50 = vld [vmem:[#allocation5 + $0xb8] sm:$0xff] }
  0x42   :  { %452 = vmatpush.msrb.mxu0 %v260_v59  ;;  %419 = vmatpush.msra.mxu3 %v247_v3  ;;  %v268_v47 = vld [vmem:[#allocation5 + $0xe8] sm:$0xff]  ;;  %v249_v54 = vld [vmem:[#allocation5 + $0x50] sm:$0xff]  ;;  %v250_v56 = vld [vmem:[#allocation5 + $0x58] sm:$0xff] }
  0x43   :  { %350 = vmatpush.msra.mxu1 %v239_v5  ;;  %385 = vmatpush.msra.mxu2 %v240_v6  ;;  %v256_v52 = vld [vmem:[#allocation5 + $0x88] sm:$0xff]  ;;  %v243_v58 = vld [vmem:[#allocation5 + $0x20] sm:$0xff] }
  0x44   :  { %453 = vmatpush.msrb.mxu0 %v254_v0  ;;  %420 = vmatpush.msra.mxu3 %v241_v7  ;;  %v244_v59 = vld [vmem:[#allocation5 + $0x28] sm:$0xff] }
  0x45   :  { %475 = vmatpush.msrb.mxu1 %v333_v13  ;;  %510 = vmatpush.msrb.mxu2 %v334_v14 }
  0x46   :  { %454 = vmatpush.msrb.mxu0 %v248_v4  ;;  %1338 = vmatpush.msrb.mxu3 %v333_v13 }
  0x47   :  { %476 = vmatpush.msrb.mxu1 %v327_v16  ;;  %511 = vmatpush.msrb.mxu2 %v328_v17 }
  0x48   :  { %455 = vmatpush.msrb.mxu0 %v242_v8  ;;  %1339 = vmatpush.msrb.mxu3 %v327_v16 }
  0x49   :  { %1312 = vmatmul.msk.f32.gmra.mxu0 %vm165_vm0, %v156_v19  ;;  %v321_v19 = vld [vmem:[#allocation5 + $0x290] sm:$0xff]  ;;  %512 = vmatpush.msrb.mxu2 %v322_v20 }
  0x4a   :  { %477 = vmatpush.msrb.mxu1 %v321_v19  ;;  %1340 = vmatpush.msrb.mxu3 %v321_v19 }
  0x4b   :  { %513 = vmatpush.msrb.mxu2 %v316_v23 }
  0x4c   :  { %478 = vmatpush.msrb.mxu1 %v315_v22  ;;  %1341 = vmatpush.msrb.mxu3 %v315_v22 }
  0x4d   :  { %514 = vmatpush.msrb.mxu2 %v310_v25 }
  0x4e   :  { %479 = vmatpush.msrb.mxu1 %v309_v24  ;;  %1342 = vmatpush.msrb.mxu3 %v309_v24 }
  0x4f   :  { %515 = vmatpush.msrb.mxu2 %v304_v29 }
  0x50   :  { %480 = vmatpush.msrb.mxu1 %v303_v27  ;;  %1343 = vmatpush.msrb.mxu3 %v303_v27 }
  0x51   :  { %1313 = vmatmul.msk.f32.gmra.mxu0 %vm165_vm0, %v157_v35  ;;  %516 = vmatpush.msrb.mxu2 %v298_v32 }
  0x52   :  { %481 = vmatpush.msrb.mxu1 %v297_v31  ;;  %1344 = vmatpush.msrb.mxu3 %v297_v31 }
  0x53   :  { %517 = vmatpush.msrb.mxu2 %v292_v34 }
  0x54   :  { %482 = vmatpush.msrb.mxu1 %v291_v33  ;;  %1345 = vmatpush.msrb.mxu3 %v291_v33 }
  0x55   :  { %518 = vmatpush.msrb.mxu2 %v286_v38 }
  0x56   :  { %483 = vmatpush.msrb.mxu1 %v285_v36  ;;  %1346 = vmatpush.msrb.mxu3 %v285_v36  ;;  %v1797_v36 = vld [vmem:[%s1969_s8] sm:$0xff] }
  0x57   :  { %519 = vmatpush.msrb.mxu2 %v280_v41 }
  0x58   :  { %484 = vmatpush.msrb.mxu1 %v279_v40  ;;  %1347 = vmatpush.msrb.mxu3 %v279_v40 }
  0x59   :  { %1314 = vmatmul.msk.f32.gmra.mxu0 %vm165_vm0, %v158_v51  ;;  %520 = vmatpush.msrb.mxu2 %v274_v43  ;;  %v255_v51 = vld [vmem:[#allocation5 + $0x80] sm:$0xff] }
  0x5a   :  { %485 = vmatpush.msrb.mxu1 %v273_v42  ;;  %1348 = vmatpush.msrb.mxu3 %v273_v42 }
  0x5b   :  { %521 = vmatpush.msrb.mxu2 %v268_v47 }
  0x5c   :  { %486 = vmatpush.msrb.mxu1 %v267_v45  ;;  %1349 = vmatpush.msrb.mxu3 %v267_v45  ;;  %v777_v45 = vld [vmem:[#allocation7 + $0x2d0] sm:$0xff] }
  0x5d   :  { %522 = vmatpush.msrb.mxu2 %v262_v50  ;;  %v772_v50 = vld [vmem:[#allocation7 + $0x2a8] sm:$0xff] }
  0x5e   :  { %487 = vmatpush.msrb.mxu1 %v261_v49  ;;  %1350 = vmatpush.msrb.mxu3 %v261_v49  ;;  %v771_v49 = vld [vmem:[#allocation7 + $0x2a0] sm:$0xff] }
  0x5f   :  { %523 = vmatpush.msrb.mxu2 %v256_v52  ;;  %v765_v52 = vld [vmem:[#allocation7 + $0x270] sm:$0xff] }
  0x60   :  { %488 = vmatpush.msrb.mxu1 %v255_v51  ;;  %1351 = vmatpush.msrb.mxu3 %v255_v51  ;;  %v774_v51 = vld [vmem:[#allocation7 + $0x2b8] sm:$0xff] }
  0x61   :  { %1315 = vmatmul.msk.f32.gmra.mxu0 %vm165_vm0, %v159_v60  ;;  %524 = vmatpush.msrb.mxu2 %v250_v56  ;;  %v759_v56 = vld [vmem:[#allocation7 + $0x240] sm:$0xff] }
  0x62   :  { %489 = vmatpush.msrb.mxu1 %v249_v54  ;;  %1352 = vmatpush.msrb.mxu3 %v249_v54  ;;  %v768_v54 = vld [vmem:[#allocation7 + $0x288] sm:$0xff] }
  0x63   :  { %525 = vmatpush.msrb.mxu2 %v244_v59  ;;  %v762_v59 = vld [vmem:[#allocation7 + $0x258] sm:$0xff] }
  0x64   :  { %490 = vmatpush.msrb.mxu1 %v243_v58  ;;  %1353 = vmatpush.msrb.mxu3 %v243_v58  ;;  %v760_v58 = vld [vmem:[#allocation7 + $0x248] sm:$0xff] }
  0xa6   :  { %v207_v10 = vpop.f32.mrf.mxu0 }
  0xa7   :  { %v208_v11 = vadd.f32 %v1748_v9, %v207_v10 }
  0xa9   :  { %v1751_v12 = vmax.f32 %v208_v11, 0.0 }
  0xab   :  { %351 = vmatmul.f32.vlgmr.msra.gmra.mxu1 %v1751_v12  ;;  %386 = vmatmul.f32.vlgmr.msra.gmra.mxu2 %v1751_v12 }
  0xac   :  { %421 = vmatmul.f32.vlgmr.msra.gmra.mxu3 %v1751_v12  ;;  %456 = vmatmul.f32.vlgmr.msrb.gmra.mxu0 %v1751_v12 }
  0xad   :  { %783 = vmatpush.msra.mxu1 %v777_v45  ;;  %v719_v45 = vld [vmem:[#allocation7 + $0x100] sm:$0xff] }
  0xae   :  { %v210_v15 = vpop.f32.mrf.mxu0 }
  0xaf   :  { %v211_v18 = vadd.f32 %v1748_v9, %v210_v15  ;;  %784 = vmatpush.msra.mxu1 %v771_v49  ;;  %v699_v49 = vld [vmem:[#allocation7 + $0x60] sm:$0xff] }
  0xb1   :  { %v1758_v21 = vmax.f32 %v211_v18, 0.0  ;;  %785 = vmatpush.msra.mxu1 %v765_v52  ;;  %v702_v52 = vld [vmem:[#allocation7 + $0x78] sm:$0xff] }
  0xb3   :  { %354 = vmatmul.f32.gmra.mxu1 %v1758_v21  ;;  %388 = vmatmul.f32.gmra.mxu2 %v1758_v21 }
  0xb4   :  { %423 = vmatmul.f32.gmra.mxu3 %v1758_v21  ;;  %458 = vmatmul.f32.gmra.mxu0 %v1758_v21 }
  0xb5   :  { %786 = vmatpush.msra.mxu1 %v759_v56  ;;  %v695_v56 = vld [vmem:[#allocation7 + $0x40] sm:$0xff] }
  0xb6   :  { %v213_v26 = vpop.f32.mrf.mxu0 }
  0xb7   :  { %v214_v28 = vadd.f32 %v1748_v9, %v213_v26 }
  0xb9   :  { %v1765_v30 = vmax.f32 %v214_v28, 0.0 }
  0xbb   :  { %357 = vmatmul.f32.gmra.mxu1 %v1765_v30  ;;  %390 = vmatmul.f32.gmra.mxu2 %v1765_v30 }
  0xbc   :  { %425 = vmatmul.f32.gmra.mxu3 %v1765_v30  ;;  %460 = vmatmul.f32.gmra.mxu0 %v1765_v30 }
  0xbe   :  { %v216_v35 = vpop.f32.mrf.mxu0 }
  0xbf   :  { %v217_v37 = vadd.f32 %v1748_v9, %v216_v35 }
  0xc1   :  { %v1772_v39 = vmax.f32 %v217_v37, 0.0 }
  0xc3   :  { %359 = vmatmul.f32.gmra.mxu1 %v1772_v39  ;;  %393 = vmatmul.f32.gmra.mxu2 %v1772_v39 }
  0xc4   :  { %427 = vmatmul.f32.gmra.mxu3 %v1772_v39  ;;  %462 = vmatmul.f32.gmra.mxu0 %v1772_v39 }
  0xc6   :  { %v219_v44 = vpop.f32.mrf.mxu0 }
  0xc7   :  { %v220_v46 = vadd.f32 %v1748_v9, %v219_v44  ;;  %v1811_v44 = vld [vmem:[%s1972_s11] sm:$0xff] }
  0xc9   :  { %v235_v48 = vmax.f32 %v220_v46, 0.0  ;;  %v778_v46 = vld [vmem:[#allocation7 + $0x2d8] sm:$0xff] }
  0xca   :  { %818 = vmatpush.msra.mxu2 %v778_v46 }
  0xcb   :  { %361 = vmatmul.f32.gmra.mxu1 %v235_v48  ;;  %396 = vmatmul.f32.gmra.mxu2 %v235_v48 }
  0xcc   :  { %429 = vmatmul.f32.gmra.mxu3 %v235_v48  ;;  %464 = vmatmul.f32.gmra.mxu0 %v235_v48 }
  0xcd   :  { %819 = vmatpush.msra.mxu2 %v772_v50  ;;  %v700_v50 = vld [vmem:[#allocation7 + $0x68] sm:$0xff] }
  0xce   :  { %v222_v53 = vpop.f32.mrf.mxu0 }
  0xcf   :  { %v223_v55 = vadd.f32 %v1748_v9, %v222_v53  ;;  %v766_v53 = vld [vmem:[#allocation7 + $0x278] sm:$0xff] }
  0xd0   :  { %820 = vmatpush.msra.mxu2 %v766_v53  ;;  %v693_v53 = vld [vmem:[#allocation7 + $0x30] sm:$0xff] }
  0xd1   :  { %v236_v57 = vmax.f32 %v223_v55, 0.0  ;;  %v1819_v55 = vld [vmem:[%s1970_s9] sm:$0xff] }
  0xd2   :  { %821 = vmatpush.msra.mxu2 %v760_v58  ;;  %v696_v58 = vld [vmem:[#allocation7 + $0x48] sm:$0xff] }
  0xd3   :  { %363 = vmatmul.f32.gmra.mxu1 %v236_v57  ;;  %398 = vmatmul.f32.gmra.mxu2 %v236_v57 }
  0xd4   :  { %432 = vmatmul.f32.gmra.mxu3 %v236_v57  ;;  %466 = vmatmul.f32.gmra.mxu0 %v236_v57 }
  0xd6   :  { %v225_v60 = vpop.f32.mrf.mxu0 }
  0xd7   :  { %v226_v61 = vadd.f32 %v1748_v9, %v225_v60 }
  0xd9   :  { %v237_v62 = vmax.f32 %v226_v61, 0.0 }
  0xdb   :  { %365 = vmatmul.f32.gmra.mxu1 %v237_v62  ;;  %400 = vmatmul.f32.gmra.mxu2 %v237_v62 }
  0xdc   :  { %435 = vmatmul.f32.gmra.mxu3 %v237_v62  ;;  %468 = vmatmul.f32.gmra.mxu0 %v237_v62 }
  0xde   :  { %v228_v63 = vpop.f32.mrf.mxu0 }
  0xdf   :  { %v229_v0 = vadd.f32 %v1748_v9, %v228_v63  ;;  %v779_v63 = vld [vmem:[#allocation7 + $0x2e0] sm:$0xff] }
  0xe1   :  { %v238_v1 = vmax.f32 %v229_v0, 0.0  ;;  %v754_v0 = vld [vmem:[#allocation7 + $0x218] sm:$0xff] }
  0xe2   :  { %822 = vmatpush.msra.mxu2 %v754_v0 }
  0xe3   :  { %367 = vmatmul.f32.gmra.mxu1 %v238_v1  ;;  %402 = vmatmul.f32.gmra.mxu2 %v238_v1 }
  0xe4   :  { %437 = vmatmul.f32.gmra.mxu3 %v238_v1  ;;  %471 = vmatmul.f32.gmra.mxu0 %v238_v1 }
  0xeb   :  { %491 = vmatmul.f32.vlgmr.msrb.gmra.mxu1 %v1751_v12  ;;  %526 = vmatmul.f32.vlgmr.msrb.gmra.mxu2 %v1751_v12 }
  0xec   :  { %507 = vmatmul.f32.vlgmr.msrb.gmra.mxu3 %v238_v1 }
  0xf3   :  { %494 = vmatmul.f32.gmra.mxu1 %v1758_v21  ;;  %528 = vmatmul.f32.gmra.mxu2 %v1758_v21 }
  0xfb   :  { %497 = vmatmul.f32.gmra.mxu1 %v1765_v30  ;;  %530 = vmatmul.f32.gmra.mxu2 %v1765_v30 }
 0x103   :  { %499 = vmatmul.f32.gmra.mxu1 %v1772_v39  ;;  %533 = vmatmul.f32.gmra.mxu2 %v1772_v39  ;;  %v1804_v39 = vld [vmem:[%s1969_s8 + $0x8] sm:$0xff] }
 0x10b   :  { %501 = vmatmul.f32.gmra.mxu1 %v235_v48  ;;  %536 = vmatmul.f32.gmra.mxu2 %v235_v48  ;;  %v780_v48 = vld [vmem:[#allocation7 + $0x2e8] sm:$0xff] }
 0x113   :  { %503 = vmatmul.f32.gmra.mxu1 %v236_v57  ;;  %538 = vmatmul.f32.gmra.mxu2 %v236_v57  ;;  %v1824_v57 = vld [vmem:[%s1972_s11 + $0x8] sm:$0xff] }
 0x11b   :  { %505 = vmatmul.f32.gmra.mxu1 %v237_v62  ;;  %540 = vmatmul.f32.gmra.mxu2 %v237_v62  ;;  %v753_v62 = vld [vmem:[#allocation7 + $0x210] sm:$0xff] }
 0x11c   :  { %787 = vmatpush.msra.mxu1 %v753_v62  ;;  %v690_v62 = vld [vmem:[#allocation7 + $0x18] sm:$0xff] }
 0x123   :  { %542 = vmatmul.f32.gmra.mxu2 %v238_v1 }
 0x128   :  { %v1790_v2 = vpop.f32.mrf.mxu1 }
 0x129   :  { %v457_v3 = vpop.f32.mrf.mxu0 }
 0x12a   :  { %v747_v3 = vld [vmem:[#allocation7 + $0x1e0] sm:$0xff] }
 0x12b   :  { %788 = vmatpush.msra.mxu1 %v747_v3 }
 0x12e   :  { %v387_v4 = vpop.f32.mrf.mxu2 }
 0x12f   :  { %v422_v5 = vpop.f32.mrf.mxu3  ;;  %v773_v4 = vld [vmem:[#allocation7 + $0x2b0] sm:$0xff] }
 0x130   :  { %v1792_v6 = vpop.f32.mrf.mxu1  ;;  %v748_v5 = vld [vmem:[#allocation7 + $0x1e8] sm:$0xff] }
 0x131   :  { %v459_v7 = vpop.f32.mrf.mxu0  ;;  %823 = vmatpush.msra.mxu2 %v748_v5 }
 0x132   :  { %v741_v7 = vld [vmem:[#allocation7 + $0x1b0] sm:$0xff] }
 0x133   :  { %789 = vmatpush.msra.mxu1 %v741_v7  ;;  %v782_v7 = vld [vmem:[#allocation7 + $0x2f8] sm:$0xff] }
 0x136   :  { %v389_v8 = vpop.f32.mrf.mxu2 }
 0x137   :  { %v424_v9 = vpop.f32.mrf.mxu3  ;;  %v1834_v8 = vld [vmem:[%s1970_s9 + $0x8] sm:$0xff]  ;;  %s1599_s9 = smov [#allocation13]  }
 0x138   :  { %v358_v10 = vpop.f32.mrf.mxu1  ;;  %v742_v9 = vld [vmem:[#allocation7 + $0x1b8] sm:$0xff]  ;;  %s1293_s19 = sshll.u32 %s1599_s9, 4  ;;  %s1294_s19 = int_to_ptr.vmem [resolvable:$true] %s1293_s19 }
 0x139   :  { %v461_v11 = vpop.f32.mrf.mxu0  ;;  %v767_v10 = vld [vmem:[#allocation7 + $0x280] sm:$0xff]  ;;  %824 = vmatpush.msra.mxu2 %v742_v9 }
 0x13a   :  { %v744_v11 = vld [vmem:[#allocation7 + $0x1c8] sm:$0xff]  ;;  %v775_v9 = vld [vmem:[#allocation7 + $0x2c0] sm:$0xff] }
 0x13e   :  { %v391_v12 = vpop.f32.mrf.mxu2 }
 0x13f   :  { %v426_v13 = vpop.f32.mrf.mxu3 }
 0x140   :  { %v360_v14 = vpop.f32.mrf.mxu1  ;;  %v736_v13 = vld [vmem:[#allocation7 + $0x188] sm:$0xff] }
 0x141   :  { %v463_v15 = vpop.f32.mrf.mxu0  ;;  %825 = vmatpush.msra.mxu2 %v736_v13  ;;  %v763_v13 = vld [vmem:[#allocation7 + $0x260] sm:$0xff] }
 0x142   :  { %v761_v15 = vld [vmem:[#allocation7 + $0x250] sm:$0xff] }
 0x146   :  { %v394_v16 = vpop.f32.mrf.mxu2 }
 0x147   :  { %v428_v17 = vpop.f32.mrf.mxu3 }
 0x148   :  { %v362_v18 = vpop.f32.mrf.mxu1  ;;  %v729_v17 = vld [vmem:[#allocation7 + $0x150] sm:$0xff] }
 0x149   :  { %v465_v19 = vpop.f32.mrf.mxu0  ;;  %v730_v18 = vld [vmem:[#allocation7 + $0x158] sm:$0xff] }
 0x14a   :  { %826 = vmatpush.msra.mxu2 %v730_v18 }
 0x14e   :  { %v397_v20 = vpop.f32.mrf.mxu2 }
 0x14f   :  { %v430_v21 = vpop.f32.mrf.mxu3  ;;  %v755_v20 = vld [vmem:[#allocation7 + $0x220] sm:$0xff] }
 0x150   :  { %v364_v22 = vpop.f32.mrf.mxu1 }
 0x151   :  { %v467_v23 = vpop.f32.mrf.mxu0  ;;  %v723_v22 = vld [vmem:[#allocation7 + $0x120] sm:$0xff] }
 0x152   :  { %v724_v23 = vld [vmem:[#allocation7 + $0x128] sm:$0xff] }
 0x153   :  { %827 = vmatpush.msra.mxu2 %v724_v23  ;;  %v745_v23 = vld [vmem:[#allocation7 + $0x1d0] sm:$0xff] }
 0x156   :  { %v399_v24 = vpop.f32.mrf.mxu2 }
 0x157   :  { %v433_v25 = vpop.f32.mrf.mxu3  ;;  %v749_v24 = vld [vmem:[#allocation7 + $0x1f0] sm:$0xff] }
 0x158   :  { %676 = vmatpush.msra.mxu0 %v433_v25  ;;  %v366_v26 = vpop.f32.mrf.mxu1  ;;  %v726_v25 = vld [vmem:[#allocation7 + $0x138] sm:$0xff] }
 0x159   :  { %v469_v42 = vpop.f32.mrf.mxu0  ;;  %v1841_v26 = vld [vmem:[%s1971_s10] sm:$0xff] }
 0x15a   :  { %677 = vmatpush.msra.mxu0 %v430_v21  ;;  %v732_v21 = vld [vmem:[#allocation7 + $0x168] sm:$0xff] }
 0x15b   :  { %1322 = vmatmul.msk.f32.vlgmr.msra.gmra.mxu0 %vm620_vm2, %v1811_v44 }
 0x15c   :  { %888 = vmatpush.msrb.mxu0 %v780_v48  ;;  %v707_v48 = vld [vmem:[#allocation7 + $0xa0] sm:$0xff] }
 0x15e   :  { %v401_v27 = vpop.f32.mrf.mxu2  ;;  %889 = vmatpush.msrb.mxu0 %v774_v51  ;;  %v701_v51 = vld [vmem:[#allocation7 + $0x70] sm:$0xff] }
 0x15f   :  { %v436_v28 = vpop.f32.mrf.mxu3  ;;  %v717_v27 = vld [vmem:[#allocation7 + $0xf0] sm:$0xff] }
 0x160   :  { %v368_v29 = vpop.f32.mrf.mxu1  ;;  %890 = vmatpush.msrb.mxu0 %v768_v54  ;;  %v743_v28 = vld [vmem:[#allocation7 + $0x1c0] sm:$0xff]  ;;  %v694_v54 = vld [vmem:[#allocation7 + $0x38] sm:$0xff] }
 0x161   :  { %v472_v60 = vpop.f32.mrf.mxu0  ;;  %v718_v29 = vld [vmem:[#allocation7 + $0xf8] sm:$0xff] }
 0x162   :  { %891 = vmatpush.msrb.mxu0 %v762_v59  ;;  %828 = vmatpush.msra.mxu2 %v718_v29  ;;  %v687_v59 = vld [vmem:[#allocation7] sm:$0xff]  ;;  %v733_v29 = vld [vmem:[#allocation7 + $0x170] sm:$0xff] }
 0x163   :  { %1323 = vmatmul.msk.f32.gmra.mxu0 %vm620_vm2, %v1824_v57 }
 0x166   :  { %v403_v30 = vpop.f32.mrf.mxu2 }
 0x167   :  { %v438_v31 = vpop.f32.mrf.mxu3  ;;  %v720_v30 = vld [vmem:[#allocation7 + $0x108] sm:$0xff] }
 0x168   :  { %v492_v32 = vpop.f32.mrf.mxu1  ;;  %v711_v31 = vld [vmem:[#allocation7 + $0xc0] sm:$0xff] }
 0x16e   :  { %v527_v33 = vpop.f32.mrf.mxu2 }
 0x16f   :  { %v508_v34 = vpop.f32.mrf.mxu3  ;;  %v737_v33 = vld [vmem:[#allocation7 + $0x190] sm:$0xff] }
 0x170   :  { %v495_v35 = vpop.f32.mrf.mxu1  ;;  %v712_v34 = vld [vmem:[#allocation7 + $0xc8] sm:$0xff] }
 0x171   :  { %568 = vmatpush.msra.mxu3 %v495_v35  ;;  %v714_v35 = vld [vmem:[#allocation7 + $0xd8] sm:$0xff]  ;;  %829 = vmatpush.msra.mxu2 %v712_v34  ;;  %v728_v34 = vld [vmem:[#allocation7 + $0x148] sm:$0xff] }
 0x173   :  { %569 = vmatpush.msra.mxu3 %v492_v32 }
 0x175   :  { %570 = vmatpush.msra.mxu3 %v394_v16  ;;  %v738_v16 = vld [vmem:[#allocation7 + $0x198] sm:$0xff] }
 0x176   :  { %v529_v37 = vpop.f32.mrf.mxu2 }
 0x177   :  { %571 = vmatpush.msra.mxu3 %v391_v12  ;;  %v735_v12 = vld [vmem:[#allocation7 + $0x180] sm:$0xff]  ;;  %v705_v37 = vld [vmem:[#allocation7 + $0x90] sm:$0xff] }
 0x178   :  { %v498_v38 = vpop.f32.mrf.mxu1  ;;  %1316 = vmatmul.msk.f32.vlgmr.msra.gmra.mxu3 %vm549_vm1, %v1797_v36  ;;  %790 = vmatpush.msra.mxu1 %v735_v12  ;;  %v770_v12 = vld [vmem:[#allocation7 + $0x298] sm:$0xff] }
 0x179   :  { %v731_v38 = vld [vmem:[#allocation7 + $0x160] sm:$0xff] }
 0x17a   :  { %791 = vmatpush.msra.mxu1 %v729_v17  ;;  %v758_v17 = vld [vmem:[#allocation7 + $0x238] sm:$0xff] }
 0x17c   :  { %792 = vmatpush.msra.mxu1 %v723_v22 }
 0x17e   :  { %v531_v40 = vpop.f32.mrf.mxu2  ;;  %793 = vmatpush.msra.mxu1 %v717_v27  ;;  %v740_v27 = vld [vmem:[#allocation7 + $0x1a8] sm:$0xff] }
 0x180   :  { %v500_v41 = vpop.f32.mrf.mxu1  ;;  %1317 = vmatmul.msk.f32.gmra.mxu3 %vm549_vm1, %v1804_v39  ;;  %794 = vmatpush.msra.mxu1 %v711_v31 }
 0x181   :  { %v708_v41 = vld [vmem:[#allocation7 + $0xa8] sm:$0xff] }
 0x182   :  { %795 = vmatpush.msra.mxu1 %v705_v37  ;;  %v721_v37 = vld [vmem:[#allocation7 + $0x110] sm:$0xff] }
 0x184   :  { %796 = vmatpush.msra.mxu1 %v699_v49  ;;  %v703_v49 = vld [vmem:[#allocation7 + $0x80] sm:$0xff] }
 0x186   :  { %v534_v43 = vpop.f32.mrf.mxu2  ;;  %797 = vmatpush.msra.mxu1 %v693_v53  ;;  %v697_v53 = vld [vmem:[#allocation7 + $0x50] sm:$0xff] }
 0x187   :  { %603 = vmatpush.msrb.mxu3 %v534_v43  ;;  %v1848_v43 = vld [vmem:[%s1971_s10 + $0x8] sm:$0xff]  ;;  %s1988_s10 = sld [smem:[#allocation22_spill]] }
 0x188   :  { %v502_v47 = vpop.f32.mrf.mxu1  ;;  %798 = vmatpush.msra.mxu1 %v687_v59 }
 0x189   :  { %604 = vmatpush.msrb.mxu3 %v531_v40  ;;  %v706_v40 = vld [vmem:[#allocation7 + $0x98] sm:$0xff]  ;;  %v713_v47 = vld [vmem:[#allocation7 + $0xd0] sm:$0xff] }
 0x18a   :  { %830 = vmatpush.msra.mxu2 %v706_v40 }
 0x18b   :  { %605 = vmatpush.msrb.mxu3 %v1792_v6  ;;  %v750_v6 = vld [vmem:[#allocation7 + $0x1f8] sm:$0xff] }
 0x18c   :  { %831 = vmatpush.msra.mxu2 %v700_v50  ;;  %v704_v50 = vld [vmem:[#allocation7 + $0x88] sm:$0xff] }
 0x18d   :  { %606 = vmatpush.msrb.mxu3 %v1790_v2  ;;  %v756_v2 = vld [vmem:[#allocation7 + $0x228] sm:$0xff]  ;;  %s1295_s29 = sshll.u32 %s1988_s10, 4  ;;  %s1296_s29 = int_to_ptr.hbm [resolvable:$true] %s1295_s29 }
 0x18e   :  { %v537_v61 = vpop.f32.mrf.mxu2  ;;  %1318 = vmatmul.msk.f32.vlgmr.msrb.gmra.mxu3 %vm549_vm1, %v1819_v55  ;;  %892 = vmatpush.msrb.mxu0 %v756_v2 }
 0x18f   :  { %641 = vmatpush.msra.mxu3 %v472_v60  ;;  %832 = vmatpush.msra.mxu2 %v694_v54  ;;  %v688_v60 = vld [vmem:[#allocation7 + $0x8] sm:$0xff]  ;;  %v689_v61 = vld [vmem:[#allocation7 + $0x10] sm:$0xff]  ;;  %v698_v54 = vld [vmem:[#allocation7 + $0x58] sm:$0xff] }
 0x190   :  { %v504_v1 = vpop.f32.mrf.mxu1  ;;  %893 = vmatpush.msrb.mxu0 %v750_v6  ;;  %v781_v6 = vld [vmem:[#allocation7 + $0x2f0] sm:$0xff] }
 0x191   :  { %642 = vmatpush.msra.mxu3 %v469_v42  ;;  %v725_v42 = vld [vmem:[#allocation7 + $0x130] sm:$0xff]  ;;  %833 = vmatpush.msra.mxu2 %v688_v60  ;;  %v691_v60 = vld [vmem:[#allocation7 + $0x20] sm:$0xff] }
 0x192   :  { %894 = vmatpush.msrb.mxu0 %v744_v11  ;;  %923 = vmatpush.msrb.mxu1 %v781_v6  ;;  %v769_v11 = vld [vmem:[#allocation7 + $0x290] sm:$0xff] }
 0x193   :  { %853 = vmatpush.msrb.mxu3 %v779_v63  ;;  %v1393_v63 = vld [vmem:[%s1966_s5] ss:$0 sm:$0xff]  ;;  %958 = vmatpush.msrb.mxu2 %v782_v7 }
 0x194   :  { %895 = vmatpush.msrb.mxu0 %v738_v16  ;;  %924 = vmatpush.msrb.mxu1 %v775_v9  ;;  %v757_v16 = vld [vmem:[#allocation7 + $0x230] sm:$0xff] }
 0x195   :  { %854 = vmatpush.msrb.mxu3 %v773_v4 }
 0x196   :  { %v539_v14 = vpop.f32.mrf.mxu2  ;;  %1319 = vmatmul.msk.f32.gmra.mxu3 %vm549_vm1, %v1834_v8  ;;  %896 = vmatpush.msrb.mxu0 %v732_v21 }
 0x197   :  { %855 = vmatpush.msrb.mxu3 %v767_v10  ;;  %v776_v10 = vld [vmem:[#allocation7 + $0x2c8] sm:$0xff]  ;;  %925 = vmatpush.msrb.mxu1 %v769_v11 }
 0x198   :  { %v506_v19 = vpop.f32.mrf.mxu1  ;;  %897 = vmatpush.msrb.mxu0 %v726_v25  ;;  %959 = vmatpush.msrb.mxu2 %v776_v10  ;;  %v764_v14 = vld [vmem:[#allocation7 + $0x268] sm:$0xff]  ;;  %v739_v25 = vld [vmem:[#allocation7 + $0x1a0] sm:$0xff] }
 0x199   :  { %856 = vmatpush.msrb.mxu3 %v761_v15  ;;  %v1394_v15 = vld [vmem:[%s1966_s5 + $0x1] ss:$0 sm:$0xff]  ;;  %926 = vmatpush.msrb.mxu1 %v763_v13  ;;  %v751_v19 = vld [vmem:[#allocation7 + $0x200] sm:$0xff] }
 0x19a   :  { %898 = vmatpush.msrb.mxu0 %v720_v30  ;;  %960 = vmatpush.msrb.mxu2 %v770_v12  ;;  %v734_v30 = vld [vmem:[#allocation7 + $0x178] sm:$0xff] }
 0x19b   :  { %857 = vmatpush.msrb.mxu3 %v755_v20  ;;  %v752_v20 = vld [vmem:[#allocation7 + $0x208] sm:$0xff]  ;;  %927 = vmatpush.msrb.mxu1 %v757_v16 }
 0x19c   :  { %899 = vmatpush.msrb.mxu0 %v714_v35  ;;  %961 = vmatpush.msrb.mxu2 %v764_v14  ;;  %v1395_v35 = vld [vmem:[%s1966_s5 + $0x2] ss:$0 sm:$0xff] }
 0x19d   :  { %858 = vmatpush.msrb.mxu3 %v749_v24  ;;  %928 = vmatpush.msrb.mxu1 %v751_v19  ;;  %v746_v24 = vld [vmem:[#allocation7 + $0x1d8] sm:$0xff] }
 0x19e   :  { %v541_v32 = vpop.f32.mrf.mxu2  ;;  %1320 = vmatmul.msk.f32.vlgmr.msra.gmra.mxu3 %vm620_vm2, %v1841_v26  ;;  %900 = vmatpush.msrb.mxu0 %v708_v41  ;;  %v715_v41 = vld [vmem:[#allocation7 + $0xe0] sm:$0xff] }
 0x19f   :  { %859 = vmatpush.msrb.mxu3 %v743_v28  ;;  %962 = vmatpush.msrb.mxu2 %v758_v17 }
 0x1a0   :  { %901 = vmatpush.msrb.mxu0 %v702_v52  ;;  %929 = vmatpush.msrb.mxu1 %v745_v23 }
 0x1a1   :  { %860 = vmatpush.msrb.mxu3 %v737_v33  ;;  %963 = vmatpush.msrb.mxu2 %v752_v20  ;;  %v727_v33 = vld [vmem:[#allocation7 + $0x140] sm:$0xff] }
 0x1a2   :  { %902 = vmatpush.msrb.mxu0 %v696_v58  ;;  %930 = vmatpush.msrb.mxu1 %v739_v25  ;;  %v1396_v58 = vld [vmem:[%s1966_s5 + $0x3] ss:$0 sm:$0xff] }
 0x1a3   :  { %861 = vmatpush.msrb.mxu3 %v731_v38  ;;  %964 = vmatpush.msrb.mxu2 %v746_v24  ;;  %v722_v38 = vld [vmem:[#allocation7 + $0x118] sm:$0xff] }
 0x1a4   :  { %903 = vmatpush.msrb.mxu0 %v690_v62  ;;  %931 = vmatpush.msrb.mxu1 %v733_v29 }
 0x1a5   :  { %862 = vmatpush.msrb.mxu3 %v725_v42  ;;  %965 = vmatpush.msrb.mxu2 %v740_v27  ;;  %v716_v42 = vld [vmem:[#allocation7 + $0xe8] sm:$0xff] }
 0x1a6   :  { %v543_v46 = vpop.f32.mrf.mxu2  ;;  %1321 = vmatmul.msk.f32.gmra.mxu3 %vm620_vm2, %v1848_v43  ;;  %932 = vmatpush.msrb.mxu1 %v727_v33 }
 0x1a7   :  { %863 = vmatpush.msrb.mxu3 %v719_v45  ;;  %966 = vmatpush.msrb.mxu2 %v734_v30 }
 0x1a8   :  { %933 = vmatpush.msrb.mxu1 %v721_v37 }
 0x1a9   :  { %864 = vmatpush.msrb.mxu3 %v713_v47  ;;  %967 = vmatpush.msrb.mxu2 %v728_v34  ;;  %v709_v47 = vld [vmem:[#allocation7 + $0xb0] sm:$0xff] }
 0x1aa   :  { %934 = vmatpush.msrb.mxu1 %v715_v41 }
 0x1ab   :  { %865 = vmatpush.msrb.mxu3 %v707_v48  ;;  %968 = vmatpush.msrb.mxu2 %v722_v38  ;;  %v710_v48 = vld [vmem:[#allocation7 + $0xb8] sm:$0xff] }
 0x1ac   :  { %935 = vmatpush.msrb.mxu1 %v709_v47 }
 0x1ad   :  { %866 = vmatpush.msrb.mxu3 %v701_v51  ;;  %969 = vmatpush.msrb.mxu2 %v716_v42 }
 0x1ae   :  { %936 = vmatpush.msrb.mxu1 %v703_v49 }
 0x1af   :  { %867 = vmatpush.msrb.mxu3 %v695_v56  ;;  %970 = vmatpush.msrb.mxu2 %v710_v48 }
 0x1b0   :  { %937 = vmatpush.msrb.mxu1 %v697_v53  ;;  %v1594_v53 = vmov 0  }
 0x1b1   :  { %868 = vmatpush.msrb.mxu3 %v689_v61  ;;  %971 = vmatpush.msrb.mxu2 %v704_v50  ;;  %v692_v61 = vld [vmem:[#allocation7 + $0x28] sm:$0xff] }
 0x1b2   :  { %938 = vmatpush.msrb.mxu1 %v691_v60  ;;  %1386 = vset.pattern.permute.xlu0 %v1594_v53 }
 0x1b3   :  { %1354 = vmatpush.msra.mxu3 %v782_v7  ;;  %972 = vmatpush.msrb.mxu2 %v698_v54 }
 0x1b5   :  { %1355 = vmatpush.msra.mxu3 %v776_v10  ;;  %973 = vmatpush.msrb.mxu2 %v692_v61 }
 0x1b7   :  { %1356 = vmatpush.msra.mxu3 %v770_v12 }
 0x1b9   :  { %1357 = vmatpush.msra.mxu3 %v764_v14 }
 0x1bb   :  { %1358 = vmatpush.msra.mxu3 %v758_v17 }
 0x1bd   :  { %1359 = vmatpush.msra.mxu3 %v752_v20 }
 0x1bf   :  { %1360 = vmatpush.msra.mxu3 %v746_v24 }
 0x1c1   :  { %1361 = vmatpush.msra.mxu3 %v740_v27 }
 0x1c3   :  { %1362 = vmatpush.msra.mxu3 %v734_v30 }
 0x1c5   :  { %1363 = vmatpush.msra.mxu3 %v728_v34 }
 0x1c7   :  { %1364 = vmatpush.msra.mxu3 %v722_v38 }
 0x1c9   :  { %1365 = vmatpush.msra.mxu3 %v716_v42 }
 0x1cb   :  { %1366 = vmatpush.msra.mxu3 %v710_v48 }
 0x1cd   :  { %1367 = vmatpush.msra.mxu3 %v704_v50  ;;  %v1093_v50 = vld [vmem:[%s1987_s28] sm:$0xff] }
 0x1ce   :  { %vm1096_vm3 = vcmp.ge.s32.totalorder %v1093_v50, 0 }
 0x1cf   :  { %1368 = vmatpush.msra.mxu3 %v698_v54  ;;  %v1097_v54 = vsel %vm1096_vm3, %v1093_v50, 4294967295 }
 0x1d0   :  { %1099 = vperm.xlu0 %1386, %v1097_v54  }
 0x1d1   :  { %1369 = vmatpush.msra.mxu3 %v692_v61 }
 0x1d8   :  { %v679_v52 = vpop.f32.mrf.mxu0 }
 0x1d9   :  { %v680_v62 = vadd.f32 %v1396_v58, %v679_v52 }
 0x1fb   :  { %v573_v0 = vpop.f32.mrf.mxu3 }
 0x1fc   :  { %v574_v1 = vadd.f32 %v1393_v63, %v573_v0  ;;  %v682_v0 = vpop.f32.mrf.mxu0 }
 0x1fe   :  { %v1855_v2 = vmax.f32 %v574_v1, 0.0  ;;  %v683_v1 = vadd.f32 %v1396_v58, %v682_v0  ;;  %v1105_v58 = vadd.s32 16, %v1093_v50 }
 0x200   :  { %799 = vmatmul.f32.vlgmr.msra.gmra.mxu1 %v1855_v2  ;;  %834 = vmatmul.f32.vlgmr.msra.gmra.mxu2 %v1855_v2 }
 0x201   :  { %869 = vmatmul.f32.vlgmr.msrb.gmra.mxu3 %v1855_v2  ;;  %904 = vmatmul.f32.vlgmr.msrb.gmra.mxu0 %v1855_v2 }
 0x203   :  { %v576_v3 = vpop.f32.mrf.mxu3 }
 0x204   :  { %v577_v4 = vadd.f32 %v1393_v63, %v576_v3  ;;  %v685_v63 = vmax.f32 %v680_v62, 0.0  ;;  %v686_v3 = vmax.f32 %v683_v1, 0.0 }
 0x206   :  { %v1861_v5 = vmax.f32 %v577_v4, 0.0 }
 0x208   :  { %802 = vmatmul.f32.gmra.mxu1 %v1861_v5  ;;  %836 = vmatmul.f32.gmra.mxu2 %v1861_v5 }
 0x209   :  { %871 = vmatmul.f32.gmra.mxu3 %v1861_v5  ;;  %906 = vmatmul.f32.gmra.mxu0 %v1861_v5 }
 0x211   :  { %v608_v18 = vpop.f32.mrf.mxu3 }
 0x212   :  { %v609_v21 = vadd.f32 %v1394_v15, %v608_v18 }
 0x214   :  { %v1870_v22 = vmax.f32 %v609_v21, 0.0 }
 0x216   :  { %805 = vmatmul.f32.gmra.mxu1 %v1870_v22  ;;  %838 = vmatmul.f32.gmra.mxu2 %v1870_v22 }
 0x217   :  { %873 = vmatmul.f32.gmra.mxu3 %v1870_v22  ;;  %908 = vmatmul.f32.gmra.mxu0 %v1870_v22 }
 0x219   :  { %v611_v28 = vpop.f32.mrf.mxu3 }
 0x21a   :  { %v612_v31 = vadd.f32 %v1394_v15, %v611_v28 }
 0x21c   :  { %v1876_v32 = vmax.f32 %v612_v31, 0.0 }
 0x21e   :  { %807 = vmatmul.f32.gmra.mxu1 %v1876_v32  ;;  %841 = vmatmul.f32.gmra.mxu2 %v1876_v32 }
 0x21f   :  { %875 = vmatmul.f32.gmra.mxu3 %v1876_v32  ;;  %910 = vmatmul.f32.gmra.mxu0 %v1876_v32 }
 0x221   :  { %v644_v40 = vpop.f32.mrf.mxu3 }
 0x222   :  { %v645_v45 = vadd.f32 %v1395_v35, %v644_v40 }
 0x224   :  { %v650_v46 = vmax.f32 %v645_v45, 0.0 }
 0x226   :  { %809 = vmatmul.f32.gmra.mxu1 %v650_v46  ;;  %844 = vmatmul.f32.gmra.mxu2 %v650_v46 }
 0x227   :  { %877 = vmatmul.f32.gmra.mxu3 %v650_v46  ;;  %912 = vmatmul.f32.gmra.mxu0 %v650_v46 }
 0x229   :  { %v647_v51 = vpop.f32.mrf.mxu3 }
 0x22a   :  { %v648_v56 = vadd.f32 %v1395_v35, %v647_v51  ;;  %v1114_v51 = vadd.s32 32, %v1093_v50 }
 0x22c   :  { %v651_v59 = vmax.f32 %v648_v56, 0.0  ;;  %v1596_v56 = vmov 3  }
 0x22d   :  { %1390 = vset.pattern.permute.xlu2 %v1596_v56 }
 0x22e   :  { %811 = vmatmul.f32.gmra.mxu1 %v651_v59  ;;  %846 = vmatmul.f32.gmra.mxu2 %v651_v59 }
 0x22f   :  { %880 = vmatmul.f32.gmra.mxu3 %v651_v59  ;;  %914 = vmatmul.f32.gmra.mxu0 %v651_v59 }
 0x236   :  { %813 = vmatmul.f32.gmra.mxu1 %v685_v63  ;;  %848 = vmatmul.f32.gmra.mxu2 %v685_v63 }
 0x237   :  { %883 = vmatmul.f32.gmra.mxu3 %v685_v63  ;;  %916 = vmatmul.f32.gmra.mxu0 %v685_v63 }
 0x23e   :  { %815 = vmatmul.f32.gmra.mxu1 %v686_v3  ;;  %850 = vmatmul.f32.gmra.mxu2 %v686_v3 }
 0x23f   :  { %885 = vmatmul.f32.gmra.mxu3 %v686_v3  ;;  %919 = vmatmul.f32.gmra.mxu0 %v686_v3 }
 0x246   :  { %939 = vmatmul.f32.vlgmr.msrb.gmra.mxu1 %v1855_v2  ;;  %974 = vmatmul.f32.vlgmr.msrb.gmra.mxu2 %v1855_v2 }
 0x247   :  { %990 = vmatmul.f32.vlgmr.msra.gmra.mxu3 %v686_v3 }
 0x24e   :  { %942 = vmatmul.f32.gmra.mxu1 %v1861_v5  ;;  %976 = vmatmul.f32.gmra.mxu2 %v1861_v5 }
 0x256   :  { %945 = vmatmul.f32.gmra.mxu1 %v1870_v22  ;;  %978 = vmatmul.f32.gmra.mxu2 %v1870_v22 }
 0x25e   :  { %947 = vmatmul.f32.gmra.mxu1 %v1876_v32  ;;  %981 = vmatmul.f32.gmra.mxu2 %v1876_v32 }
 0x266   :  { %949 = vmatmul.f32.gmra.mxu1 %v650_v46  ;;  %984 = vmatmul.f32.gmra.mxu2 %v650_v46 }
 0x26e   :  { %951 = vmatmul.f32.gmra.mxu1 %v651_v59  ;;  %986 = vmatmul.f32.gmra.mxu2 %v651_v59  ;;  %v1123_v59 = vadd.s32 48, %v1093_v50 }
 0x270   :  { %v1124_v62 = vsel %vm1096_vm3, %v1123_v59, 4294967295  ;;  %v1219_v59 = vld [vmem:[#allocation10 + $0x68] sm:$0xff] }
 0x276   :  { %953 = vmatmul.f32.gmra.mxu1 %v685_v63  ;;  %988 = vmatmul.f32.gmra.mxu2 %v685_v63  ;;  %v1597_v63 = vmov 1  }
 0x277   :  { %1387 = vset.pattern.permute.xlu0 %v1597_v63  ;;  %v1214_v63 = vld [vmem:[#allocation10 + $0x40] sm:$0xff] }
 0x27d   :  { %v1896_v4 = vpop.f32.mrf.mxu1 }
 0x27e   :  { %955 = vmatmul.f32.gmra.mxu1 %v686_v3  ;;  %v905_v2 = vpop.f32.mrf.mxu0 }
 0x283   :  { %v835_v6 = vpop.f32.mrf.mxu2 }
 0x284   :  { %v870_v5 = vpop.f32.mrf.mxu3 }
 0x285   :  { %v803_v9 = vpop.f32.mrf.mxu1  ;;  %v1598_v5 = vmov 0.0  }
 0x286   :  { %v907_v7 = vpop.f32.mrf.mxu0 }
 0x287   :  { %v1180_v7 = vld [vmem:[#allocation8 + $0x78] sm:$0xff] }
 0x28b   :  { %v837_v10 = vpop.f32.mrf.mxu2 }
 0x28c   :  { %v872_v11 = vpop.f32.mrf.mxu3  ;;  %v1100_v10 = vpop.permute.xlu0 %1099 }
 0x293   :  { %v806_v12 = vpop.f32.mrf.mxu1 }
 0x294   :  { %v909_v13 = vpop.f32.mrf.mxu0 }
 0x295   :  { %v1176_v13 = vld [vmem:[#allocation8 + $0x58] sm:$0xff] }
 0x299   :  { %v839_v14 = vpop.f32.mrf.mxu2 }
 0x29a   :  { %v874_v15 = vpop.f32.mrf.mxu3 }
 0x29b   :  { %v808_v16 = vpop.f32.mrf.mxu1  ;;  %v1094_v15 = vlaneseq }
 0x29c   :  { %v911_v17 = vpop.f32.mrf.mxu0  ;;  %v1175_v16 = vld [vmem:[#allocation8 + $0x50] sm:$0xff] }
 0x29d   :  { %v1174_v17 = vld [vmem:[#allocation8 + $0x48] sm:$0xff] }
 0x2a1   :  { %v842_v18 = vpop.f32.mrf.mxu2 }
 0x2a2   :  { %v876_v19 = vpop.f32.mrf.mxu3 }
 0x2a3   :  { %v810_v20 = vpop.f32.mrf.mxu1  ;;  %v1095_v19 = vand.u32 127, %v1094_v15  ;;  %v1254_v15 = vld [vmem:[#allocation11 + $0x38] sm:$0xff] }
 0x2a4   :  { %v913_v21 = vpop.f32.mrf.mxu0  ;;  %v1173_v20 = vld [vmem:[#allocation8 + $0x40] sm:$0xff] }
 0x2a5   :  { %v1399_v21 = vld [vmem:[%s1968_s7 + $0x3] ss:$0 sm:$0xff]  ;;  %vm1101_vm4 = vcmp.eq.s32.totalorder %v1095_v19, %v1100_v10  ;;  %v1260_v10 = vld [vmem:[#allocation11 + $0x68] sm:$0xff] }
 0x2a9   :  { %v845_v22 = vpop.f32.mrf.mxu2 }
 0x2aa   :  { %v878_v23 = vpop.f32.mrf.mxu3 }
 0x2ab   :  { %v812_v24 = vpop.f32.mrf.mxu1 }
 0x2ac   :  { %v915_v25 = vpop.f32.mrf.mxu0 }
 0x2ad   :  { %v1172_v25 = vld [vmem:[#allocation8 + $0x38] sm:$0xff] }
 0x2b1   :  { %v847_v27 = vpop.f32.mrf.mxu2 }
 0x2b2   :  { %v881_v28 = vpop.f32.mrf.mxu3  ;;  %v1400_v27 = vld [vmem:[%s1968_s7 + $0x2] ss:$0 sm:$0xff] }
 0x2b3   :  { %v814_v29 = vpop.f32.mrf.mxu1 }
 0x2b4   :  { %v917_v37 = vpop.f32.mrf.mxu0  ;;  %v1171_v29 = vld [vmem:[#allocation8 + $0x30] sm:$0xff] }
 0x2b9   :  { %v849_v30 = vpop.f32.mrf.mxu2 }
 0x2ba   :  { %v884_v31 = vpop.f32.mrf.mxu3 }
 0x2bb   :  { %v816_v32 = vpop.f32.mrf.mxu1 }
 0x2bc   :  { %v920_v45 = vpop.f32.mrf.mxu0  ;;  %v1170_v32 = vld [vmem:[#allocation8 + $0x28] sm:$0xff] }
 0x2c1   :  { %v851_v33 = vpop.f32.mrf.mxu2 }
 0x2c2   :  { %v886_v34 = vpop.f32.mrf.mxu3  ;;  %v1332_v33 = vsel %vm1101_vm4, 1.0, %v1598_v5 }
 0x2c3   :  { %v940_v35 = vpop.f32.mrf.mxu1 }
 0x2c9   :  { %v975_v38 = vpop.f32.mrf.mxu2 }
 0x2ca   :  { %v991_v40 = vpop.f32.mrf.mxu3 }
 0x2cb   :  { %v943_v41 = vpop.f32.mrf.mxu1 }
 0x2cc   :  { %1007 = vmatpush.msrb.mxu3 %v943_v41 }
 0x2ce   :  { %1008 = vmatpush.msrb.mxu3 %v940_v35  ;;  %v1169_v35 = vld [vmem:[#allocation8 + $0x20] sm:$0xff] }
 0x2d0   :  { %1009 = vmatpush.msrb.mxu3 %v842_v18 }
 0x2d1   :  { %v977_v42 = vpop.f32.mrf.mxu2 }
 0x2d2   :  { %1010 = vmatpush.msrb.mxu3 %v839_v14  ;;  %v1168_v42 = vld [vmem:[#allocation8 + $0x18] sm:$0xff] }
 0x2d3   :  { %v946_v46 = vpop.f32.mrf.mxu1  ;;  %1324 = vmatmul.msk.f32.vlgmr.msrb.gmra.mxu3 %vm549_vm1, %v1797_v36  ;;  %v1595_v36 = vmov 2  }
 0x2d4   :  { %1059 = vmatpush.msra.mxu3 %v920_v45  ;;  %1388 = vset.pattern.permute.xlu1 %v1595_v36  ;;  %v1166_v36 = vld [vmem:[#allocation8 + $0x8] sm:$0xff] }
 0x2d6   :  { %1060 = vmatpush.msra.mxu3 %v917_v37  ;;  %v1397_v37 = vld [vmem:[%s1968_s7 + $0x1] ss:$0 sm:$0xff] }
 0x2d9   :  { %v979_v47 = vpop.f32.mrf.mxu2 }
 0x2db   :  { %v948_v48 = vpop.f32.mrf.mxu1  ;;  %1325 = vmatmul.msk.f32.gmra.mxu3 %vm549_vm1, %v1804_v39  ;;  %v1115_v39 = vsel %vm1096_vm3, %v1114_v51, 4294967295 }
 0x2dc   :  { %1117 = vperm.xlu1 %1388, %v1115_v39   ;;  %v1165_v39 = vld [vmem:[#allocation8] sm:$0xff] }
 0x2e1   :  { %v982_v49 = vpop.f32.mrf.mxu2 }
 0x2e2   :  { %1032 = vmatpush.msra.mxu0 %v982_v49  ;;  %v1398_v49 = vld [vmem:[%s1968_s7] ss:$0 sm:$0xff] }
 0x2e3   :  { %v950_v52 = vpop.f32.mrf.mxu1  ;;  %1328 = vmatmul.msk.f32.vlgmr.msra.gmra.mxu3 %vm620_vm2, %v1841_v26  ;;  %v1106_v26 = vsel %vm1096_vm3, %v1105_v58, 4294967295  ;;  %v1220_v58 = vld [vmem:[#allocation10 + $0x70] sm:$0xff] }
 0x2e4   :  { %1033 = vmatpush.msra.mxu0 %v979_v47  ;;  %1389 = vset.pattern.permute.xlu1 %v1596_v56  ;;  %v1167_v47 = vld [vmem:[#allocation8 + $0x10] sm:$0xff] }
 0x2e5   :  { %1108 = vperm.xlu0 %1387, %v1106_v26   ;;  %1126 = vperm.xlu1 %1389, %v1124_v62   ;;  %v1216_v26 = vld [vmem:[#allocation10 + $0x50] sm:$0xff]  ;;  %v1215_v62 = vld [vmem:[#allocation10 + $0x48] sm:$0xff] }
 0x2e6   :  { %1034 = vmatpush.msra.mxu0 %v803_v9  ;;  %v1179_v9 = vld [vmem:[#allocation8 + $0x70] sm:$0xff] }
 0x2e8   :  { %1035 = vmatpush.msra.mxu0 %v1896_v4 }
 0x2e9   :  { %v985_v60 = vpop.f32.mrf.mxu2  ;;  %1326 = vmatmul.msk.f32.vlgmr.msra.gmra.mxu0 %vm549_vm1, %v1819_v55 }
 0x2ea   :  { %1084 = vmatpush.msrb.mxu0 %v881_v28  ;;  %v1218_v60 = vld [vmem:[#allocation10 + $0x60] sm:$0xff] }
 0x2eb   :  { %v952_v61 = vpop.f32.mrf.mxu1  ;;  %1329 = vmatmul.msk.f32.gmra.mxu3 %vm620_vm2, %v1848_v43 }
 0x2ec   :  { %1085 = vmatpush.msrb.mxu0 %v878_v23  ;;  %v1217_v61 = vld [vmem:[#allocation10 + $0x58] sm:$0xff] }
 0x2ed   :  { %1391 = vset.pattern.permute.xlu0 %v1596_v56  ;;  %v1221_v56 = vld [vmem:[#allocation10 + $0x78] sm:$0xff] }
 0x2ee   :  { %1185 = vmatpush.msra.mxu0 %v1180_v7  ;;  %1226 = vmatpush.msra.mxu1 %v1221_v56  ;;  %v1206_v7 = vld [vmem:[#allocation10] sm:$0xff] }
 0x2f0   :  { %1186 = vmatpush.msra.mxu0 %v1179_v9  ;;  %1227 = vmatpush.msra.mxu1 %v1220_v58  ;;  %v1262_v9 = vld [vmem:[#allocation11 + $0x78] sm:$0xff] }
 0x2f1   :  { %v987_v0 = vpop.f32.mrf.mxu2  ;;  %1327 = vmatmul.msk.f32.gmra.mxu0 %vm549_vm1, %v1834_v8  ;;  %v1337_v8 = vsel %vm1096_vm3, 1.0, %v1598_v5  ;;  %1267 = vmatpush.msra.mxu2 %v1262_v9 }
 0x2f2   :  { %1404 = vrcp.f32 %v1337_v8  ;;  %1228 = vmatpush.msra.mxu1 %v1219_v59  ;;  %v1213_v0 = vld [vmem:[#allocation10 + $0x38] sm:$0xff]  ;;  %v1207_v8 = vld [vmem:[#allocation10 + $0x8] sm:$0xff] }
 0x2f3   :  { %v954_v1 = vpop.f32.mrf.mxu1 }
 0x2f4   :  { %1229 = vmatpush.msra.mxu1 %v1218_v60  ;;  %v1212_v1 = vld [vmem:[#allocation10 + $0x30] sm:$0xff] }
 0x2f6   :  { %1230 = vmatpush.msra.mxu1 %v1217_v61 }
 0x2f8   :  { %v1405_v14 = vpop.eup %1404  ;;  %1231 = vmatpush.msra.mxu1 %v1216_v26 }
 0x2f9   :  { %v989_v55 = vpop.f32.mrf.mxu2  ;;  %1330 = vmatmul.msk.f32.vlgmr.msrb.gmra.mxu0 %vm620_vm2, %v1811_v44  ;;  %v1178_v44 = vld [vmem:[#allocation8 + $0x68] sm:$0xff]  ;;  %1161 = vperm.xlu2 %1390, %v1405_v14   ;;  %v1255_v14 = vld [vmem:[#allocation11 + $0x40] sm:$0xff] }
 0x2fa   :  { %1187 = vmatpush.msra.mxu0 %v1178_v44  ;;  %1232 = vmatpush.msra.mxu1 %v1215_v62  ;;  %v1211_v55 = vld [vmem:[#allocation10 + $0x28] sm:$0xff]  ;;  %v1261_v44 = vld [vmem:[#allocation11 + $0x70] sm:$0xff] }
 0x2fb   :  { %v956_v3 = vpop.f32.mrf.mxu1  ;;  %1268 = vmatpush.msra.mxu2 %v1261_v44 }
 0x2fc   :  { %1233 = vmatpush.msra.mxu1 %v1214_v63  ;;  %v1210_v3 = vld [vmem:[#allocation10 + $0x20] sm:$0xff] }
 0x2fd   :  { %1269 = vmatpush.msra.mxu2 %v1260_v10 }
 0x2fe   :  { %1234 = vmatpush.msra.mxu1 %v1213_v0 }
 0x300   :  { %1235 = vmatpush.msra.mxu1 %v1212_v1 }
 0x301   :  { %1331 = vmatmul.msk.f32.gmra.mxu0 %vm620_vm2, %v1824_v57  ;;  %v1177_v57 = vld [vmem:[#allocation8 + $0x60] sm:$0xff] }
 0x302   :  { %1188 = vmatpush.msra.mxu0 %v1177_v57  ;;  %1236 = vmatpush.msra.mxu1 %v1211_v55  ;;  %v1258_v57 = vld [vmem:[#allocation11 + $0x58] sm:$0xff] }
 0x304   :  { %1189 = vmatpush.msra.mxu0 %v1176_v13  ;;  %1237 = vmatpush.msra.mxu1 %v1210_v3  ;;  %v1256_v13 = vld [vmem:[#allocation11 + $0x48] sm:$0xff] }
 0x306   :  { %1190 = vmatpush.msra.mxu0 %v1175_v16  ;;  %v1253_v16 = vld [vmem:[#allocation11 + $0x30] sm:$0xff] }
 0x308   :  { %1191 = vmatpush.msra.mxu0 %v1174_v17  ;;  %v1252_v17 = vld [vmem:[#allocation11 + $0x28] sm:$0xff] }
 0x30a   :  { %1192 = vmatpush.msra.mxu0 %v1173_v20  ;;  %v1401_v20 = vld [vmem:[%s1974_s13] ss:$0 sm:$0xff] }
 0x30c   :  { %1193 = vmatpush.msra.mxu0 %v1172_v25  ;;  %v1248_v25 = vld [vmem:[#allocation11 + $0x8] sm:$0xff] }
 0x30e   :  { %1194 = vmatpush.msra.mxu0 %v1171_v29 }
 0x310   :  { %1195 = vmatpush.msra.mxu0 %v1170_v32  ;;  %v1403_v32 = vld [vmem:[%s1978_s17] ss:$0 sm:$0xff] }
 0x312   :  { %1196 = vmatpush.msra.mxu0 %v1169_v35 }
 0x314   :  { %1197 = vmatpush.msra.mxu0 %v1168_v42 }
 0x316   :  { %1198 = vmatpush.msra.mxu0 %v1167_v47 }
 0x318   :  { %1199 = vmatpush.msra.mxu0 %v1166_v36 }
 0x31a   :  { %1200 = vmatpush.msra.mxu0 %v1165_v39 }
 0x34e   :  { %v1118_v18 = vpop.permute.xlu1 %1117 }
 0x34f   :  { %vm1119_vm6 = vcmp.eq.s32.totalorder %v1095_v19, %v1118_v18  ;;  %v1251_v18 = vld [vmem:[#allocation11 + $0x20] sm:$0xff] }
 0x350   :  { %v1334_v46 = vsel %vm1119_vm6, 1.0, %v1598_v5 }
 0x356   :  { %v1922_v43 = vpop.f32.mrf.mxu3 }
 0x357   :  { %v1109_v22 = vpop.permute.xlu0 %1108  ;;  %v1127_v40 = vpop.permute.xlu1 %1126  ;;  %v1013_v53 = vadd.f32 %v1398_v49, %v1922_v43  ;;  %v1209_v43 = vld [vmem:[#allocation10 + $0x18] sm:$0xff] }
 0x358   :  { %vm1110_vm5 = vcmp.eq.s32.totalorder %v1095_v19, %v1109_v22  ;;  %vm1128_vm7 = vcmp.eq.s32.totalorder %v1095_v19, %v1127_v40  ;;  %1238 = vmatpush.msra.mxu1 %v1209_v43  ;;  %v1250_v19 = vld [vmem:[#allocation11 + $0x18] sm:$0xff] }
 0x359   :  { %v1333_v34 = vsel %vm1110_vm5, 1.0, %v1598_v5  ;;  %v1335_v52 = vsel %vm1128_vm7, 1.0, %v1598_v5  ;;  %v1208_v5 = vld [vmem:[#allocation10 + $0x10] sm:$0xff] }
 0x35a   :  { %v1113_v41 = vadd.f32 %v1333_v34, %v1332_v33  ;;  %1239 = vmatpush.msra.mxu1 %v1208_v5 }
 0x35c   :  { %v1122_v50 = vadd.f32 %v1334_v46, %v1113_v41  ;;  %1240 = vmatpush.msra.mxu1 %v1207_v8 }
 0x35e   :  { %v1926_v4 = vpop.f32.mrf.mxu3  ;;  %v1131_v54 = vadd.f32 %v1335_v52, %v1122_v50  ;;  %1241 = vmatpush.msra.mxu1 %v1206_v7 }
 0x35f   :  { %v1016_v51 = vadd.f32 %v1398_v49, %v1926_v4 }
 0x366   :  { %v1924_v2 = vpop.f32.mrf.mxu0  ;;  %v1062_v11 = vpop.f32.mrf.mxu3 }
 0x367   :  { %v1063_v38 = vadd.f32 %v1400_v27, %v1062_v11  ;;  %v1038_v48 = vadd.f32 %v1397_v37, %v1924_v2  ;;  %v1162_v2 = vpop.permute.xlu2 %1161  ;;  %v1259_v11 = vld [vmem:[#allocation11 + $0x60] sm:$0xff] }
 0x368   :  { %1270 = vmatpush.msra.mxu2 %v1259_v11 }
 0x36a   :  { %1271 = vmatpush.msra.mxu2 %v1258_v57 }
 0x36e   :  { %v1040_v6 = vpop.f32.mrf.mxu0  ;;  %v1065_v24 = vpop.f32.mrf.mxu3 }
 0x36f   :  { %v1066_v31 = vadd.f32 %v1400_v27, %v1065_v24  ;;  %v1041_v45 = vadd.f32 %v1397_v37, %v1040_v6  ;;  %v1249_v24 = vld [vmem:[#allocation11 + $0x10] sm:$0xff]  ;;  %v1247_v27 = vld [vmem:[#allocation11] sm:$0xff] }
 0x376   :  { %v1087_v12 = vpop.f32.mrf.mxu0 }
 0x377   :  { %v1088_v30 = vadd.f32 %v1399_v21, %v1087_v12  ;;  %v1257_v12 = vld [vmem:[#allocation11 + $0x50] sm:$0xff] }
 0x378   :  { %1272 = vmatpush.msra.mxu2 %v1257_v12 }
 0x37a   :  { %1273 = vmatpush.msra.mxu2 %v1256_v13 }
 0x37c   :  { %1274 = vmatpush.msra.mxu2 %v1255_v14 }
 0x37e   :  { %v1090_v23 = vpop.f32.mrf.mxu0  ;;  %1275 = vmatpush.msra.mxu2 %v1254_v15 }
 0x37f   :  { %v1091_v28 = vadd.f32 %v1399_v21, %v1090_v23 }
 0x380   :  { %1276 = vmatpush.msra.mxu2 %v1253_v16 }
 0x381   :  { %1144 = vmatpush.msrb.mxu3 %v1091_v28  ;;  %v1402_v28 = vld [vmem:[%s1976_s15] ss:$0 sm:$0xff] }
 0x382   :  { %1277 = vmatpush.msra.mxu2 %v1252_v17 }
 0x383   :  { %1145 = vmatpush.msrb.mxu3 %v1088_v30 }
 0x384   :  { %1278 = vmatpush.msra.mxu2 %v1251_v18 }
 0x385   :  { %1146 = vmatpush.msrb.mxu3 %v1066_v31 }
 0x386   :  { %1279 = vmatpush.msra.mxu2 %v1250_v19 }
 0x387   :  { %1147 = vmatpush.msrb.mxu3 %v1063_v38 }
 0x388   :  { %1280 = vmatpush.msra.mxu2 %v1249_v24 }
 0x389   :  { %1148 = vmatpush.msrb.mxu3 %v1041_v45 }
 0x38a   :  { %1281 = vmatpush.msra.mxu2 %v1248_v25 }
 0x38b   :  { %1149 = vmatpush.msrb.mxu3 %v1038_v48 }
 0x38c   :  { %1282 = vmatpush.msra.mxu2 %v1247_v27 }
 0x38d   :  { %1150 = vmatpush.msrb.mxu3 %v1016_v51 }
 0x38f   :  { %1151 = vmatpush.msrb.mxu3 %v1013_v53 }
 0x390   :  { %1336 = vmatmul.msk.f32.vlgmr.msrb.gmra.mxu3 %vm1132_vm8, %v1131_v54 }
 0x413   :  { %v1153_v4 = vpop.f32.mrf.mxu3 }
 0x414   :  { %v1164_v6 = vmul.f32 %v1162_v2, %v1153_v4 }
 0x416   :  { %1201 = vmatmul.f32.vlgmr.msra.gmra.mxu0 %v1164_v6 }
 0x493   :  { %v1202_v21 = vpop.f32.mrf.mxu0 }
 0x494   :  { %v1203_v22 = vadd.f32 %v1401_v20, %v1202_v21 }
 0x496   :  { %v1205_v23 = vmax.f32 %v1203_v22, 0.0 }
 0x498   :  { %1242 = vmatmul.f32.vlgmr.msra.gmra.mxu1 %v1205_v23 }
 0x515   :  { %v1243_v29 = vpop.f32.mrf.mxu1 }
 0x516   :  { %v1244_v30 = vadd.f32 %v1402_v28, %v1243_v29 }
 0x518   :  { %v1246_v31 = vmax.f32 %v1244_v30, 0.0 }
 0x51a   :  { %1283 = vmatmul.f32.vlgmr.msra.gmra.mxu2 %v1246_v31 }
 0x59d   :  { %v1284_v33 = vpop.f32.mrf.mxu2 }
 0x59e   :  { %v1285_v34 = vadd.f32 %v1403_v32, %v1284_v33 }
 0x5a0   :  { %1287 = vst [vmem:[#allocation13] sm:$0xff] %v1285_v34 }
 0x5a1   :  { %1298 = dma.vmem_to_hbm [thread:$0]  %s1294_s19, 128, %s1296_s29, [#allocation4]  }
 0x5a2   :  { %1582 = dma.done.wait [#allocation4], 128  }
 0x5a3   :  { %1583 = vsyncadd [#allocation4], 4294967168 }
 0x5a4   :  { %1303 = vsyncpa [#allocation3], 1 }
 0x5a5   :  { %1304 = vsyncpa [#allocation6], 1 }
 0x5a6   :  { %1305 = vsyncpa [#allocation9], 1 }
 0x5a7   :  { %1306 = vsyncpa [#allocation12], 1 }
 0x5a8   :  { %1307 = vsyncpa [#allocation4], 1 }

</bundles_post_ra>
